<compile_context>
chip_gen: v5e
topology: v5e:2x2
jax: 0.10.0
libtpu: 0.0.40
codegen_flags: <defaults>
</compile_context>

<pallas_src>
import numpy as np
import jax
import jax.numpy as jnp
from jax.experimental import pallas as pl
from jax.experimental.pallas import tpu as pltpu

PAD_ID = 0
EOS_ID = 2


def _search_head_kernel(sel_ids_ref, gpos_ref,      # scalar prefetch (SMEM)
                        emb_hbm, pos_hbm,           # full tables, HBM (pl.ANY)
                        w_ref, b_ref, scale_ref,    # VMEM input blocks
                        out_ref,                    # (N, HB) output block
                        x_emb, x_pos, sem):         # scratch
    """One column block of the projection head, with fused row gather.

    sel_ids_ref : (N,)    i32 SMEM  token id at each row's last <eos> position
    gpos_ref    : (N,)    i32 SMEM  that position (0 if the row has no <eos>)
    emb_hbm     : (V, H)  f32 HBM   token embedding table
    pos_hbm     : (S, H)  f32 HBM   position embedding table
    w_ref       : (H, HB) bf16      decoder projection column block
    b_ref       : (1, HB) f32
    scale_ref   : (N, 1)  f32       1.0 if the row has an <eos>, else 0.0
    out_ref     : (N, HB) f32
    """
    n_rows = x_emb.shape[0]

    # Batched row-gather: issue all 2N DMAs, then wait for all of them.
    # All copies on a shared semaphore are equal-sized and we only read the
    # buffers after every wait has completed, so completion order is irrelevant.
    for n in range(n_rows):
        pltpu.make_async_copy(emb_hbm.at[pl.ds(sel_ids_ref[n], 1), :],
                              x_emb.at[pl.ds(n, 1), :], sem.at[0]).start()
        pltpu.make_async_copy(pos_hbm.at[pl.ds(gpos_ref[n], 1), :],
                              x_pos.at[pl.ds(n, 1), :], sem.at[1]).start()
    for n in range(n_rows):
        pltpu.make_async_copy(emb_hbm.at[pl.ds(0, 1), :],
                              x_emb.at[pl.ds(n, 1), :], sem.at[0]).wait()
        pltpu.make_async_copy(pos_hbm.at[pl.ds(0, 1), :],
                              x_pos.at[pl.ds(n, 1), :], sem.at[1]).wait()

    # f32 add (matches the reference), bf16 into the MXU, f32 accumulation.
    x = (x_emb[...] + x_pos[...]).astype(jnp.bfloat16)                  # (N, H)
    h = jnp.dot(x, w_ref[...], preferred_element_type=jnp.float32)      # (N, HB)
    out_ref[...] = jnp.tanh(h + b_ref[...]) * scale_ref[...]


def _forward_impl(code_inputs, nl_inputs, emb_table, pos_table, dec_w_bf16, dec_b):
    bs, S = code_inputs.shape
    N = 2 * bs
    H = emb_table.shape[-1]

    source_ids = jnp.concatenate([code_inputs, nl_inputs], axis=0)        # (N, S)

    # Last <eos> position per row (tiny int32 glue, left to XLA).
    pos = jnp.arange(S, dtype=jnp.int32)[None, :]
    last_eos = jnp.max(jnp.where(source_ids == EOS_ID, pos, -1), axis=1)  # (N,)
    has_eos = last_eos >= 0
    gather_pos = jnp.maximum(last_eos, 0).astype(jnp.int32)
    sel_ids = jnp.take_along_axis(
        source_ids, gather_pos[:, None], axis=1)[:, 0].astype(jnp.int32)
    scale = has_eos.astype(jnp.float32)[:, None]                          # (N, 1)

    # Column-tile W: G=2 keeps both v7x TensorCores busy ("parallel" axis) and
    # pipelines the 2nd W block's DMA behind the 1st block's compute on 1-TC
    # chips.  More splits would only add per-step overhead for this
    # latency-bound head.  (G=1 when H is not a multiple of 256 — the unused
    # 2nd pipeline buffer is then a few hundred KiB of wasted VMEM, harmless.)
    G = 2 if H % 256 == 0 else 1
    HB = H // G

    grid_spec = pltpu.PrefetchScalarGridSpec(
        num_scalar_prefetch=2,
        grid=(G,),
        in_specs=[
            pl.BlockSpec(memory_space=pl.ANY),                     # emb_table
            pl.BlockSpec(memory_space=pl.ANY),                     # pos_table
            pl.BlockSpec((H, HB), lambda g, sel, gp: (0, g)),      # dec_w bf16
            pl.BlockSpec((1, HB), lambda g, sel, gp: (0, g)),      # dec_b
            pl.BlockSpec((N, 1), lambda g, sel, gp: (0, 0)),       # scale
        ],
        out_specs=pl.BlockSpec((N, HB), lambda g, sel, gp: (0, g)),
        scratch_shapes=[
            pltpu.VMEM((N, H), jnp.float32),          # gathered token rows
            pltpu.VMEM((N, H), jnp.float32),          # gathered position rows
            pltpu.SemaphoreType.DMA((2,)),
        ],
    )

    vec = pl.pallas_call(
        _search_head_kernel,
        out_shape=jax.ShapeDtypeStruct((N, H), jnp.float32),
        grid_spec=grid_spec,
        compiler_params=pltpu.CompilerParams(
            dimension_semantics=("parallel",)),
        cost_estimate=pl.CostEstimate(
            flops=2 * N * H * H,
            transcendentals=N * H,
            bytes_accessed=(2 * N * H * 4 * G   # row gathers (per column step)
                            + H * H * 2         # W (bf16)
                            + H * 4 + N * 4     # bias + scale
                            + N * H * 4)),      # output
    )(sel_ids, gather_pos, emb_table, pos_table, dec_w_bf16, dec_b, scale)

    # Tiny (N, H) -> (bs, 2, H) relayout; leaving it to XLA keeps the kernel's
    # stores full-tile and lane-dense.
    return jnp.stack([vec[:bs], vec[bs:]], axis=1)


_forward_jit = jax.jit(_forward_impl)


def _host_validate(code_inputs, nl_inputs):
    """Mirrors the torch ValueError in get_t5_vec.

    Runs only on concrete (host-visible) inputs; if search_model_forward is
    itself called under an outer jit/vmap the inputs are tracers and this
    becomes a documented no-op (the ValueError path is skipped).
    """
    try:
        src = np.concatenate(
            [np.asarray(code_inputs), np.asarray(nl_inputs)], axis=0)
    except (jax.errors.TracerArrayConversionError,
            jax.errors.ConcretizationTypeError):
        return
    counts = (src == EOS_ID).sum(axis=1)
    if np.unique(counts).size > 1:
        raise ValueError("All examples must have the same number of <eos> tokens.")


def search_model_forward(code_inputs, nl_inputs, params, *, validate=True):
    if validate:
        _host_validate(code_inputs, nl_inputs)
    return _forward_jit(code_inputs, nl_inputs, params["emb_table"],
                        params["pos_table"], params["dec_w"], params["dec_b"])


def reference_forward(code_inputs, nl_inputs, params):
    """Pure-JAX reference: naive full-sequence projection + one-hot select.

    Structurally the original formulation (project every token position, then
    one-hot select the last <eos>); uses the same bf16 matmul inputs as the
    kernel so the comparison is apples-to-apples.
    """
    source_ids = jnp.concatenate([code_inputs, nl_inputs], axis=0)
    N, S = source_ids.shape
    H = params["emb_table"].shape[-1]
    emb = (jnp.take(params["emb_table"], source_ids, axis=0)
           + params["pos_table"][None, :S, :])                        # (N, S, H)
    att = (source_ids != PAD_ID).astype(jnp.float32)
    h = jnp.dot(emb.astype(jnp.bfloat16).reshape(N * S, H),
                params["dec_w"],                                      # bf16
                preferred_element_type=jnp.float32).reshape(N, S, H)
    h = jnp.tanh(h + params["dec_b"][None]) * att[:, :, None]
    pos = jnp.arange(S)[None, :]
    last = jnp.max(jnp.where(source_ids == EOS_ID, pos, -1), axis=1)
    sel = (pos == last[:, None]).astype(jnp.float32)      # all-zero if no <eos>
    vec = jnp.sum(h * sel[:, :, None], axis=1)                        # (N, H)
    bs = code_inputs.shape[0]
    return jnp.stack([vec[:bs], vec[bs:]], axis=1)                    # (bs, 2, H)


if __name__ == "__main__":
    bs, S, H, vocab = 4, 16, 256, 64
    key = jax.random.PRNGKey(0)
    k = jax.random.split(key, 8)

    params = {
        # synthetic encoder/decoder stand-in (see TODO(synk) at top);
        # dec_w is pre-cast to bf16 once here, NOT per forward call.
        "emb_table": jax.random.normal(k[0], (vocab, H), jnp.float32) * 0.02,
        "pos_table": jax.random.normal(k[1], (S, H), jnp.float32) * 0.02,
        "dec_w": (jax.random.normal(k[2], (H, H), jnp.float32) * 0.02
                  ).astype(jnp.bfloat16),
        "dec_b": jax.random.normal(k[3], (1, H), jnp.float32) * 0.02,
        # RobertaClassificationHead params (present in __init__, unused by forward)
        "cls_dense_w": jax.random.normal(k[4], (2 * H, H), jnp.float32) * 0.02,
        "cls_dense_b": jnp.zeros((H,), jnp.float32),
        "cls_out_w": jax.random.normal(k[5], (H, 2), jnp.float32) * 0.02,
        "cls_out_b": jnp.zeros((2,), jnp.float32),
    }

    def make_inputs(key_, eos_positions):
        ids = jax.random.randint(key_, (bs, S), 3, vocab, dtype=jnp.int32)
        pos = jnp.arange(S, dtype=jnp.int32)[None, :]
        ep = jnp.asarray(eos_positions, dtype=jnp.int32)[:, None]
        ids = jnp.where(pos == ep, EOS_ID, ids)     # exactly one <eos> per row
        ids = jnp.where(pos > ep, PAD_ID, ids)      # trailing <pad>
        return ids

    code_inputs = make_inputs(k[6], [14, 13, 12, 11])
    nl_inputs = make_inputs(k[7], [10, 12, 14, 9])

    out = search_model_forward(code_inputs, nl_inputs, params)
    out = jax.block_until_ready(out)

    ref = reference_forward(code_inputs, nl_inputs, params)
    assert out.shape == (bs, 2, H), out.shape
    np.testing.assert_allclose(np.asarray(out), np.asarray(ref),
                               rtol=1e-4, atol=1e-5)
    print("KERNEL_OK")
</pallas_src>

<mosaic_0001>
module attributes {stable_mosaic.version = 11 : i64} {
  func.func @_search_head_kernel(%arg0: i32, %arg1: memref<8xi32, #tpu.memory_space<smem>>, %arg2: memref<8xi32, #tpu.memory_space<smem>>, %arg3: memref<64x256xf32, #tpu.memory_space<any>>, %arg4: memref<16x256xf32, #tpu.memory_space<any>>, %arg5: memref<256x128xbf16, #tpu.memory_space<vmem>>, %arg6: memref<1x128xf32, #tpu.memory_space<vmem>>, %arg7: memref<8x1xf32, #tpu.memory_space<vmem>>, %arg8: memref<8x128xf32, #tpu.memory_space<vmem>>, %arg9: memref<8x256xf32, #tpu.memory_space<vmem>>, %arg10: memref<8x256xf32, #tpu.memory_space<vmem>>, %arg11: memref<2x!tpu.dma_semaphore, #tpu.memory_space<semaphore_mem>>) attributes {dimension_semantics = [#tpu.dimension_semantics<parallel>], iteration_bounds = array<i64: 2>, scalar_prefetch = 2 : i64, scratch_operands = 3 : i64, tpu.core_type = #tpu.core_type<tc>, window_params = [{}, {}, {transform_indices = @transform_2, window_bounds = array<i64: 256, 128>}, {transform_indices = @transform_3, window_bounds = array<i64: 1, 128>}, {pipeline_mode = #tpu.pipeline_mode<synchronous>, transform_indices = @transform_4, window_bounds = array<i64: 8, 1>}, {transform_indices = @transform_5, window_bounds = array<i64: 8, 128>}]} {
    %c0 = arith.constant 0 : index
    %0 = memref.load %arg1[%c0] : memref<8xi32, #tpu.memory_space<smem>>
    %c0_i32 = arith.constant 0 : i32
    %c0_i32_0 = arith.constant 0 : i32
    %1 = tpu.memref_slice %arg3[%0, %c0_i32_0] : memref<64x256xf32, #tpu.memory_space<any>> -> memref<1x256xf32, #tpu.memory_space<any>>
    %c0_i32_1 = arith.constant 0 : i32
    %c0_i32_2 = arith.constant 0 : i32
    %2 = tpu.memref_slice %arg9[%c0_i32_1, %c0_i32_2] : memref<8x256xf32, #tpu.memory_space<vmem>> -> memref<1x256xf32, #tpu.memory_space<vmem>>
    %3 = tpu.memref_slice %arg11[%c0_i32] : memref<2x!tpu.dma_semaphore, #tpu.memory_space<semaphore_mem>> -> memref<1x!tpu.dma_semaphore, #tpu.memory_space<semaphore_mem>>
    %4 = tpu.memref_squeeze %3 : memref<1x!tpu.dma_semaphore, #tpu.memory_space<semaphore_mem>> -> memref<!tpu.dma_semaphore, #tpu.memory_space<semaphore_mem>>
    tpu.enqueue_dma source(%1 : memref<1x256xf32, #tpu.memory_space<any>>) target(%2 : memref<1x256xf32, #tpu.memory_space<vmem>>) target_semaphore(%4 : memref<!tpu.dma_semaphore, #tpu.memory_space<semaphore_mem>>)
    %c0_3 = arith.constant 0 : index
    %5 = memref.load %arg2[%c0_3] : memref<8xi32, #tpu.memory_space<smem>>
    %c1_i32 = arith.constant 1 : i32
    %c0_i32_4 = arith.constant 0 : i32
    %6 = tpu.memref_slice %arg4[%5, %c0_i32_4] : memref<16x256xf32, #tpu.memory_space<any>> -> memref<1x256xf32, #tpu.memory_space<any>>
    %c0_i32_5 = arith.constant 0 : i32
    %c0_i32_6 = arith.constant 0 : i32
    %7 = tpu.memref_slice %arg10[%c0_i32_5, %c0_i32_6] : memref<8x256xf32, #tpu.memory_space<vmem>> -> memref<1x256xf32, #tpu.memory_space<vmem>>
    %8 = tpu.memref_slice %arg11[%c1_i32] : memref<2x!tpu.dma_semaphore, #tpu.memory_space<semaphore_mem>> -> memref<1x!tpu.dma_semaphore, #tpu.memory_space<semaphore_mem>>
    %9 = tpu.memref_squeeze %8 : memref<1x!tpu.dma_semaphore, #tpu.memory_space<semaphore_mem>> -> memref<!tpu.dma_semaphore, #tpu.memory_space<semaphore_mem>>
    tpu.enqueue_dma source(%6 : memref<1x256xf32, #tpu.memory_space<any>>) target(%7 : memref<1x256xf32, #tpu.memory_space<vmem>>) target_semaphore(%9 : memref<!tpu.dma_semaphore, #tpu.memory_space<semaphore_mem>>)
    %c1 = arith.constant 1 : index
    %10 = memref.load %arg1[%c1] : memref<8xi32, #tpu.memory_space<smem>>
    %c0_i32_7 = arith.constant 0 : i32
    %c0_i32_8 = arith.constant 0 : i32
    %11 = tpu.memref_slice %arg3[%10, %c0_i32_8] : memref<64x256xf32, #tpu.memory_space<any>> -> memref<1x256xf32, #tpu.memory_space<any>>
    %c1_i32_9 = arith.constant 1 : i32
    %c0_i32_10 = arith.constant 0 : i32
    %12 = tpu.memref_slice %arg9[%c1_i32_9, %c0_i32_10] : memref<8x256xf32, #tpu.memory_space<vmem>> -> memref<1x256xf32, #tpu.memory_space<vmem>>
    %13 = tpu.memref_slice %arg11[%c0_i32_7] : memref<2x!tpu.dma_semaphore, #tpu.memory_space<semaphore_mem>> -> memref<1x!tpu.dma_semaphore, #tpu.memory_space<semaphore_mem>>
    %14 = tpu.memref_squeeze %13 : memref<1x!tpu.dma_semaphore, #tpu.memory_space<semaphore_mem>> -> memref<!tpu.dma_semaphore, #tpu.memory_space<semaphore_mem>>
    tpu.enqueue_dma source(%11 : memref<1x256xf32, #tpu.memory_space<any>>) target(%12 : memref<1x256xf32, #tpu.memory_space<vmem>>) target_semaphore(%14 : memref<!tpu.dma_semaphore, #tpu.memory_space<semaphore_mem>>)
    %c1_11 = arith.constant 1 : index
    %15 = memref.load %arg2[%c1_11] : memref<8xi32, #tpu.memory_space<smem>>
    %c1_i32_12 = arith.constant 1 : i32
    %c0_i32_13 = arith.constant 0 : i32
    %16 = tpu.memref_slice %arg4[%15, %c0_i32_13] : memref<16x256xf32, #tpu.memory_space<any>> -> memref<1x256xf32, #tpu.memory_space<any>>
    %c1_i32_14 = arith.constant 1 : i32
    %c0_i32_15 = arith.constant 0 : i32
    %17 = tpu.memref_slice %arg10[%c1_i32_14, %c0_i32_15] : memref<8x256xf32, #tpu.memory_space<vmem>> -> memref<1x256xf32, #tpu.memory_space<vmem>>
    %18 = tpu.memref_slice %arg11[%c1_i32_12] : memref<2x!tpu.dma_semaphore, #tpu.memory_space<semaphore_mem>> -> memref<1x!tpu.dma_semaphore, #tpu.memory_space<semaphore_mem>>
    %19 = tpu.memref_squeeze %18 : memref<1x!tpu.dma_semaphore, #tpu.memory_space<semaphore_mem>> -> memref<!tpu.dma_semaphore, #tpu.memory_space<semaphore_mem>>
    tpu.enqueue_dma source(%16 : memref<1x256xf32, #tpu.memory_space<any>>) target(%17 : memref<1x256xf32, #tpu.memory_space<vmem>>) target_semaphore(%19 : memref<!tpu.dma_semaphore, #tpu.memory_space<semaphore_mem>>)
    %c2 = arith.constant 2 : index
    %20 = memref.load %arg1[%c2] : memref<8xi32, #tpu.memory_space<smem>>
    %c0_i32_16 = arith.constant 0 : i32
    %c0_i32_17 = arith.constant 0 : i32
    %21 = tpu.memref_slice %arg3[%20, %c0_i32_17] : memref<64x256xf32, #tpu.memory_space<any>> -> memref<1x256xf32, #tpu.memory_space<any>>
    %c2_i32 = arith.constant 2 : i32
    %c0_i32_18 = arith.constant 0 : i32
    %22 = tpu.memref_slice %arg9[%c2_i32, %c0_i32_18] : memref<8x256xf32, #tpu.memory_space<vmem>> -> memref<1x256xf32, #tpu.memory_space<vmem>>
    %23 = tpu.memref_slice %arg11[%c0_i32_16] : memref<2x!tpu.dma_semaphore, #tpu.memory_space<semaphore_mem>> -> memref<1x!tpu.dma_semaphore, #tpu.memory_space<semaphore_mem>>
    %24 = tpu.memref_squeeze %23 : memref<1x!tpu.dma_semaphore, #tpu.memory_space<semaphore_mem>> -> memref<!tpu.dma_semaphore, #tpu.memory_space<semaphore_mem>>
    tpu.enqueue_dma source(%21 : memref<1x256xf32, #tpu.memory_space<any>>) target(%22 : memref<1x256xf32, #tpu.memory_space<vmem>>) target_semaphore(%24 : memref<!tpu.dma_semaphore, #tpu.memory_space<semaphore_mem>>)
    %c2_19 = arith.constant 2 : index
    %25 = memref.load %arg2[%c2_19] : memref<8xi32, #tpu.memory_space<smem>>
    %c1_i32_20 = arith.constant 1 : i32
    %c0_i32_21 = arith.constant 0 : i32
    %26 = tpu.memref_slice %arg4[%25, %c0_i32_21] : memref<16x256xf32, #tpu.memory_space<any>> -> memref<1x256xf32, #tpu.memory_space<any>>
    %c2_i32_22 = arith.constant 2 : i32
    %c0_i32_23 = arith.constant 0 : i32
    %27 = tpu.memref_slice %arg10[%c2_i32_22, %c0_i32_23] : memref<8x256xf32, #tpu.memory_space<vmem>> -> memref<1x256xf32, #tpu.memory_space<vmem>>
    %28 = tpu.memref_slice %arg11[%c1_i32_20] : memref<2x!tpu.dma_semaphore, #tpu.memory_space<semaphore_mem>> -> memref<1x!tpu.dma_semaphore, #tpu.memory_space<semaphore_mem>>
    %29 = tpu.memref_squeeze %28 : memref<1x!tpu.dma_semaphore, #tpu.memory_space<semaphore_mem>> -> memref<!tpu.dma_semaphore, #tpu.memory_space<semaphore_mem>>
    tpu.enqueue_dma source(%26 : memref<1x256xf32, #tpu.memory_space<any>>) target(%27 : memref<1x256xf32, #tpu.memory_space<vmem>>) target_semaphore(%29 : memref<!tpu.dma_semaphore, #tpu.memory_space<semaphore_mem>>)
    %c3 = arith.constant 3 : index
    %30 = memref.load %arg1[%c3] : memref<8xi32, #tpu.memory_space<smem>>
    %c0_i32_24 = arith.constant 0 : i32
    %c0_i32_25 = arith.constant 0 : i32
    %31 = tpu.memref_slice %arg3[%30, %c0_i32_25] : memref<64x256xf32, #tpu.memory_space<any>> -> memref<1x256xf32, #tpu.memory_space<any>>
    %c3_i32 = arith.constant 3 : i32
    %c0_i32_26 = arith.constant 0 : i32
    %32 = tpu.memref_slice %arg9[%c3_i32, %c0_i32_26] : memref<8x256xf32, #tpu.memory_space<vmem>> -> memref<1x256xf32, #tpu.memory_space<vmem>>
    %33 = tpu.memref_slice %arg11[%c0_i32_24] : memref<2x!tpu.dma_semaphore, #tpu.memory_space<semaphore_mem>> -> memref<1x!tpu.dma_semaphore, #tpu.memory_space<semaphore_mem>>
    %34 = tpu.memref_squeeze %33 : memref<1x!tpu.dma_semaphore, #tpu.memory_space<semaphore_mem>> -> memref<!tpu.dma_semaphore, #tpu.memory_space<semaphore_mem>>
    tpu.enqueue_dma source(%31 : memref<1x256xf32, #tpu.memory_space<any>>) target(%32 : memref<1x256xf32, #tpu.memory_space<vmem>>) target_semaphore(%34 : memref<!tpu.dma_semaphore, #tpu.memory_space<semaphore_mem>>)
    %c3_27 = arith.constant 3 : index
    %35 = memref.load %arg2[%c3_27] : memref<8xi32, #tpu.memory_space<smem>>
    %c1_i32_28 = arith.constant 1 : i32
    %c0_i32_29 = arith.constant 0 : i32
    %36 = tpu.memref_slice %arg4[%35, %c0_i32_29] : memref<16x256xf32, #tpu.memory_space<any>> -> memref<1x256xf32, #tpu.memory_space<any>>
    %c3_i32_30 = arith.constant 3 : i32
    %c0_i32_31 = arith.constant 0 : i32
    %37 = tpu.memref_slice %arg10[%c3_i32_30, %c0_i32_31] : memref<8x256xf32, #tpu.memory_space<vmem>> -> memref<1x256xf32, #tpu.memory_space<vmem>>
    %38 = tpu.memref_slice %arg11[%c1_i32_28] : memref<2x!tpu.dma_semaphore, #tpu.memory_space<semaphore_mem>> -> memref<1x!tpu.dma_semaphore, #tpu.memory_space<semaphore_mem>>
    %39 = tpu.memref_squeeze %38 : memref<1x!tpu.dma_semaphore, #tpu.memory_space<semaphore_mem>> -> memref<!tpu.dma_semaphore, #tpu.memory_space<semaphore_mem>>
    tpu.enqueue_dma source(%36 : memref<1x256xf32, #tpu.memory_space<any>>) target(%37 : memref<1x256xf32, #tpu.memory_space<vmem>>) target_semaphore(%39 : memref<!tpu.dma_semaphore, #tpu.memory_space<semaphore_mem>>)
    %c4 = arith.constant 4 : index
    %40 = memref.load %arg1[%c4] : memref<8xi32, #tpu.memory_space<smem>>
    %c0_i32_32 = arith.constant 0 : i32
    %c0_i32_33 = arith.constant 0 : i32
    %41 = tpu.memref_slice %arg3[%40, %c0_i32_33] : memref<64x256xf32, #tpu.memory_space<any>> -> memref<1x256xf32, #tpu.memory_space<any>>
    %c4_i32 = arith.constant 4 : i32
    %c0_i32_34 = arith.constant 0 : i32
    %42 = tpu.memref_slice %arg9[%c4_i32, %c0_i32_34] : memref<8x256xf32, #tpu.memory_space<vmem>> -> memref<1x256xf32, #tpu.memory_space<vmem>>
    %43 = tpu.memref_slice %arg11[%c0_i32_32] : memref<2x!tpu.dma_semaphore, #tpu.memory_space<semaphore_mem>> -> memref<1x!tpu.dma_semaphore, #tpu.memory_space<semaphore_mem>>
    %44 = tpu.memref_squeeze %43 : memref<1x!tpu.dma_semaphore, #tpu.memory_space<semaphore_mem>> -> memref<!tpu.dma_semaphore, #tpu.memory_space<semaphore_mem>>
    tpu.enqueue_dma source(%41 : memref<1x256xf32, #tpu.memory_space<any>>) target(%42 : memref<1x256xf32, #tpu.memory_space<vmem>>) target_semaphore(%44 : memref<!tpu.dma_semaphore, #tpu.memory_space<semaphore_mem>>)
    %c4_35 = arith.constant 4 : index
    %45 = memref.load %arg2[%c4_35] : memref<8xi32, #tpu.memory_space<smem>>
    %c1_i32_36 = arith.constant 1 : i32
    %c0_i32_37 = arith.constant 0 : i32
    %46 = tpu.memref_slice %arg4[%45, %c0_i32_37] : memref<16x256xf32, #tpu.memory_space<any>> -> memref<1x256xf32, #tpu.memory_space<any>>
    %c4_i32_38 = arith.constant 4 : i32
    %c0_i32_39 = arith.constant 0 : i32
    %47 = tpu.memref_slice %arg10[%c4_i32_38, %c0_i32_39] : memref<8x256xf32, #tpu.memory_space<vmem>> -> memref<1x256xf32, #tpu.memory_space<vmem>>
    %48 = tpu.memref_slice %arg11[%c1_i32_36] : memref<2x!tpu.dma_semaphore, #tpu.memory_space<semaphore_mem>> -> memref<1x!tpu.dma_semaphore, #tpu.memory_space<semaphore_mem>>
    %49 = tpu.memref_squeeze %48 : memref<1x!tpu.dma_semaphore, #tpu.memory_space<semaphore_mem>> -> memref<!tpu.dma_semaphore, #tpu.memory_space<semaphore_mem>>
    tpu.enqueue_dma source(%46 : memref<1x256xf32, #tpu.memory_space<any>>) target(%47 : memref<1x256xf32, #tpu.memory_space<vmem>>) target_semaphore(%49 : memref<!tpu.dma_semaphore, #tpu.memory_space<semaphore_mem>>)
    %c5 = arith.constant 5 : index
    %50 = memref.load %arg1[%c5] : memref<8xi32, #tpu.memory_space<smem>>
    %c0_i32_40 = arith.constant 0 : i32
    %c0_i32_41 = arith.constant 0 : i32
    %51 = tpu.memref_slice %arg3[%50, %c0_i32_41] : memref<64x256xf32, #tpu.memory_space<any>> -> memref<1x256xf32, #tpu.memory_space<any>>
    %c5_i32 = arith.constant 5 : i32
    %c0_i32_42 = arith.constant 0 : i32
    %52 = tpu.memref_slice %arg9[%c5_i32, %c0_i32_42] : memref<8x256xf32, #tpu.memory_space<vmem>> -> memref<1x256xf32, #tpu.memory_space<vmem>>
    %53 = tpu.memref_slice %arg11[%c0_i32_40] : memref<2x!tpu.dma_semaphore, #tpu.memory_space<semaphore_mem>> -> memref<1x!tpu.dma_semaphore, #tpu.memory_space<semaphore_mem>>
    %54 = tpu.memref_squeeze %53 : memref<1x!tpu.dma_semaphore, #tpu.memory_space<semaphore_mem>> -> memref<!tpu.dma_semaphore, #tpu.memory_space<semaphore_mem>>
    tpu.enqueue_dma source(%51 : memref<1x256xf32, #tpu.memory_space<any>>) target(%52 : memref<1x256xf32, #tpu.memory_space<vmem>>) target_semaphore(%54 : memref<!tpu.dma_semaphore, #tpu.memory_space<semaphore_mem>>)
    %c5_43 = arith.constant 5 : index
    %55 = memref.load %arg2[%c5_43] : memref<8xi32, #tpu.memory_space<smem>>
    %c1_i32_44 = arith.constant 1 : i32
    %c0_i32_45 = arith.constant 0 : i32
    %56 = tpu.memref_slice %arg4[%55, %c0_i32_45] : memref<16x256xf32, #tpu.memory_space<any>> -> memref<1x256xf32, #tpu.memory_space<any>>
    %c5_i32_46 = arith.constant 5 : i32
    %c0_i32_47 = arith.constant 0 : i32
    %57 = tpu.memref_slice %arg10[%c5_i32_46, %c0_i32_47] : memref<8x256xf32, #tpu.memory_space<vmem>> -> memref<1x256xf32, #tpu.memory_space<vmem>>
    %58 = tpu.memref_slice %arg11[%c1_i32_44] : memref<2x!tpu.dma_semaphore, #tpu.memory_space<semaphore_mem>> -> memref<1x!tpu.dma_semaphore, #tpu.memory_space<semaphore_mem>>
    %59 = tpu.memref_squeeze %58 : memref<1x!tpu.dma_semaphore, #tpu.memory_space<semaphore_mem>> -> memref<!tpu.dma_semaphore, #tpu.memory_space<semaphore_mem>>
    tpu.enqueue_dma source(%56 : memref<1x256xf32, #tpu.memory_space<any>>) target(%57 : memref<1x256xf32, #tpu.memory_space<vmem>>) target_semaphore(%59 : memref<!tpu.dma_semaphore, #tpu.memory_space<semaphore_mem>>)
    %c6 = arith.constant 6 : index
    %60 = memref.load %arg1[%c6] : memref<8xi32, #tpu.memory_space<smem>>
    %c0_i32_48 = arith.constant 0 : i32
    %c0_i32_49 = arith.constant 0 : i32
    %61 = tpu.memref_slice %arg3[%60, %c0_i32_49] : memref<64x256xf32, #tpu.memory_space<any>> -> memref<1x256xf32, #tpu.memory_space<any>>
    %c6_i32 = arith.constant 6 : i32
    %c0_i32_50 = arith.constant 0 : i32
    %62 = tpu.memref_slice %arg9[%c6_i32, %c0_i32_50] : memref<8x256xf32, #tpu.memory_space<vmem>> -> memref<1x256xf32, #tpu.memory_space<vmem>>
    %63 = tpu.memref_slice %arg11[%c0_i32_48] : memref<2x!tpu.dma_semaphore, #tpu.memory_space<semaphore_mem>> -> memref<1x!tpu.dma_semaphore, #tpu.memory_space<semaphore_mem>>
    %64 = tpu.memref_squeeze %63 : memref<1x!tpu.dma_semaphore, #tpu.memory_space<semaphore_mem>> -> memref<!tpu.dma_semaphore, #tpu.memory_space<semaphore_mem>>
    tpu.enqueue_dma source(%61 : memref<1x256xf32, #tpu.memory_space<any>>) target(%62 : memref<1x256xf32, #tpu.memory_space<vmem>>) target_semaphore(%64 : memref<!tpu.dma_semaphore, #tpu.memory_space<semaphore_mem>>)
    %c6_51 = arith.constant 6 : index
    %65 = memref.load %arg2[%c6_51] : memref<8xi32, #tpu.memory_space<smem>>
    %c1_i32_52 = arith.constant 1 : i32
    %c0_i32_53 = arith.constant 0 : i32
    %66 = tpu.memref_slice %arg4[%65, %c0_i32_53] : memref<16x256xf32, #tpu.memory_space<any>> -> memref<1x256xf32, #tpu.memory_space<any>>
    %c6_i32_54 = arith.constant 6 : i32
    %c0_i32_55 = arith.constant 0 : i32
    %67 = tpu.memref_slice %arg10[%c6_i32_54, %c0_i32_55] : memref<8x256xf32, #tpu.memory_space<vmem>> -> memref<1x256xf32, #tpu.memory_space<vmem>>
    %68 = tpu.memref_slice %arg11[%c1_i32_52] : memref<2x!tpu.dma_semaphore, #tpu.memory_space<semaphore_mem>> -> memref<1x!tpu.dma_semaphore, #tpu.memory_space<semaphore_mem>>
    %69 = tpu.memref_squeeze %68 : memref<1x!tpu.dma_semaphore, #tpu.memory_space<semaphore_mem>> -> memref<!tpu.dma_semaphore, #tpu.memory_space<semaphore_mem>>
    tpu.enqueue_dma source(%66 : memref<1x256xf32, #tpu.memory_space<any>>) target(%67 : memref<1x256xf32, #tpu.memory_space<vmem>>) target_semaphore(%69 : memref<!tpu.dma_semaphore, #tpu.memory_space<semaphore_mem>>)
    %c7 = arith.constant 7 : index
    %70 = memref.load %arg1[%c7] : memref<8xi32, #tpu.memory_space<smem>>
    %c0_i32_56 = arith.constant 0 : i32
    %c0_i32_57 = arith.constant 0 : i32
    %71 = tpu.memref_slice %arg3[%70, %c0_i32_57] : memref<64x256xf32, #tpu.memory_space<any>> -> memref<1x256xf32, #tpu.memory_space<any>>
    %c7_i32 = arith.constant 7 : i32
    %c0_i32_58 = arith.constant 0 : i32
    %72 = tpu.memref_slice %arg9[%c7_i32, %c0_i32_58] : memref<8x256xf32, #tpu.memory_space<vmem>> -> memref<1x256xf32, #tpu.memory_space<vmem>>
    %73 = tpu.memref_slice %arg11[%c0_i32_56] : memref<2x!tpu.dma_semaphore, #tpu.memory_space<semaphore_mem>> -> memref<1x!tpu.dma_semaphore, #tpu.memory_space<semaphore_mem>>
    %74 = tpu.memref_squeeze %73 : memref<1x!tpu.dma_semaphore, #tpu.memory_space<semaphore_mem>> -> memref<!tpu.dma_semaphore, #tpu.memory_space<semaphore_mem>>
    tpu.enqueue_dma source(%71 : memref<1x256xf32, #tpu.memory_space<any>>) target(%72 : memref<1x256xf32, #tpu.memory_space<vmem>>) target_semaphore(%74 : memref<!tpu.dma_semaphore, #tpu.memory_space<semaphore_mem>>)
    %c7_59 = arith.constant 7 : index
    %75 = memref.load %arg2[%c7_59] : memref<8xi32, #tpu.memory_space<smem>>
    %c1_i32_60 = arith.constant 1 : i32
    %c0_i32_61 = arith.constant 0 : i32
    %76 = tpu.memref_slice %arg4[%75, %c0_i32_61] : memref<16x256xf32, #tpu.memory_space<any>> -> memref<1x256xf32, #tpu.memory_space<any>>
    %c7_i32_62 = arith.constant 7 : i32
    %c0_i32_63 = arith.constant 0 : i32
    %77 = tpu.memref_slice %arg10[%c7_i32_62, %c0_i32_63] : memref<8x256xf32, #tpu.memory_space<vmem>> -> memref<1x256xf32, #tpu.memory_space<vmem>>
    %78 = tpu.memref_slice %arg11[%c1_i32_60] : memref<2x!tpu.dma_semaphore, #tpu.memory_space<semaphore_mem>> -> memref<1x!tpu.dma_semaphore, #tpu.memory_space<semaphore_mem>>
    %79 = tpu.memref_squeeze %78 : memref<1x!tpu.dma_semaphore, #tpu.memory_space<semaphore_mem>> -> memref<!tpu.dma_semaphore, #tpu.memory_space<semaphore_mem>>
    tpu.enqueue_dma source(%76 : memref<1x256xf32, #tpu.memory_space<any>>) target(%77 : memref<1x256xf32, #tpu.memory_space<vmem>>) target_semaphore(%79 : memref<!tpu.dma_semaphore, #tpu.memory_space<semaphore_mem>>)
    %c0_i32_64 = arith.constant 0 : i32
    %c0_i32_65 = arith.constant 0 : i32
    %c0_i32_66 = arith.constant 0 : i32
    %80 = tpu.memref_slice %arg3[%c0_i32_65, %c0_i32_66] : memref<64x256xf32, #tpu.memory_space<any>> -> memref<1x256xf32, #tpu.memory_space<any>>
    %c0_i32_67 = arith.constant 0 : i32
    %c0_i32_68 = arith.constant 0 : i32
    %81 = tpu.memref_slice %arg9[%c0_i32_67, %c0_i32_68] : memref<8x256xf32, #tpu.memory_space<vmem>> -> memref<1x256xf32, #tpu.memory_space<vmem>>
    %82 = tpu.memref_slice %arg11[%c0_i32_64] : memref<2x!tpu.dma_semaphore, #tpu.memory_space<semaphore_mem>> -> memref<1x!tpu.dma_semaphore, #tpu.memory_space<semaphore_mem>>
    %83 = tpu.memref_squeeze %82 : memref<1x!tpu.dma_semaphore, #tpu.memory_space<semaphore_mem>> -> memref<!tpu.dma_semaphore, #tpu.memory_space<semaphore_mem>>
    tpu.wait_dma2 semaphore(%83 : memref<!tpu.dma_semaphore, #tpu.memory_space<semaphore_mem>>) src(%80 : memref<1x256xf32, #tpu.memory_space<any>>) dst(%81 : memref<1x256xf32, #tpu.memory_space<vmem>>)
    %c1_i32_69 = arith.constant 1 : i32
    %c0_i32_70 = arith.constant 0 : i32
    %c0_i32_71 = arith.constant 0 : i32
    %84 = tpu.memref_slice %arg4[%c0_i32_70, %c0_i32_71] : memref<16x256xf32, #tpu.memory_space<any>> -> memref<1x256xf32, #tpu.memory_space<any>>
    %c0_i32_72 = arith.constant 0 : i32
    %c0_i32_73 = arith.constant 0 : i32
    %85 = tpu.memref_slice %arg10[%c0_i32_72, %c0_i32_73] : memref<8x256xf32, #tpu.memory_space<vmem>> -> memref<1x256xf32, #tpu.memory_space<vmem>>
    %86 = tpu.memref_slice %arg11[%c1_i32_69] : memref<2x!tpu.dma_semaphore, #tpu.memory_space<semaphore_mem>> -> memref<1x!tpu.dma_semaphore, #tpu.memory_space<semaphore_mem>>
    %87 = tpu.memref_squeeze %86 : memref<1x!tpu.dma_semaphore, #tpu.memory_space<semaphore_mem>> -> memref<!tpu.dma_semaphore, #tpu.memory_space<semaphore_mem>>
    tpu.wait_dma2 semaphore(%87 : memref<!tpu.dma_semaphore, #tpu.memory_space<semaphore_mem>>) src(%84 : memref<1x256xf32, #tpu.memory_space<any>>) dst(%85 : memref<1x256xf32, #tpu.memory_space<vmem>>)
    %c0_i32_74 = arith.constant 0 : i32
    %c0_i32_75 = arith.constant 0 : i32
    %c0_i32_76 = arith.constant 0 : i32
    %88 = tpu.memref_slice %arg3[%c0_i32_75, %c0_i32_76] : memref<64x256xf32, #tpu.memory_space<any>> -> memref<1x256xf32, #tpu.memory_space<any>>
    %c1_i32_77 = arith.constant 1 : i32
    %c0_i32_78 = arith.constant 0 : i32
    %89 = tpu.memref_slice %arg9[%c1_i32_77, %c0_i32_78] : memref<8x256xf32, #tpu.memory_space<vmem>> -> memref<1x256xf32, #tpu.memory_space<vmem>>
    %90 = tpu.memref_slice %arg11[%c0_i32_74] : memref<2x!tpu.dma_semaphore, #tpu.memory_space<semaphore_mem>> -> memref<1x!tpu.dma_semaphore, #tpu.memory_space<semaphore_mem>>
    %91 = tpu.memref_squeeze %90 : memref<1x!tpu.dma_semaphore, #tpu.memory_space<semaphore_mem>> -> memref<!tpu.dma_semaphore, #tpu.memory_space<semaphore_mem>>
    tpu.wait_dma2 semaphore(%91 : memref<!tpu.dma_semaphore, #tpu.memory_space<semaphore_mem>>) src(%88 : memref<1x256xf32, #tpu.memory_space<any>>) dst(%89 : memref<1x256xf32, #tpu.memory_space<vmem>>)
    %c1_i32_79 = arith.constant 1 : i32
    %c0_i32_80 = arith.constant 0 : i32
    %c0_i32_81 = arith.constant 0 : i32
    %92 = tpu.memref_slice %arg4[%c0_i32_80, %c0_i32_81] : memref<16x256xf32, #tpu.memory_space<any>> -> memref<1x256xf32, #tpu.memory_space<any>>
    %c1_i32_82 = arith.constant 1 : i32
    %c0_i32_83 = arith.constant 0 : i32
    %93 = tpu.memref_slice %arg10[%c1_i32_82, %c0_i32_83] : memref<8x256xf32, #tpu.memory_space<vmem>> -> memref<1x256xf32, #tpu.memory_space<vmem>>
    %94 = tpu.memref_slice %arg11[%c1_i32_79] : memref<2x!tpu.dma_semaphore, #tpu.memory_space<semaphore_mem>> -> memref<1x!tpu.dma_semaphore, #tpu.memory_space<semaphore_mem>>
    %95 = tpu.memref_squeeze %94 : memref<1x!tpu.dma_semaphore, #tpu.memory_space<semaphore_mem>> -> memref<!tpu.dma_semaphore, #tpu.memory_space<semaphore_mem>>
    tpu.wait_dma2 semaphore(%95 : memref<!tpu.dma_semaphore, #tpu.memory_space<semaphore_mem>>) src(%92 : memref<1x256xf32, #tpu.memory_space<any>>) dst(%93 : memref<1x256xf32, #tpu.memory_space<vmem>>)
    %c0_i32_84 = arith.constant 0 : i32
    %c0_i32_85 = arith.constant 0 : i32
    %c0_i32_86 = arith.constant 0 : i32
    %96 = tpu.memref_slice %arg3[%c0_i32_85, %c0_i32_86] : memref<64x256xf32, #tpu.memory_space<any>> -> memref<1x256xf32, #tpu.memory_space<any>>
    %c2_i32_87 = arith.constant 2 : i32
    %c0_i32_88 = arith.constant 0 : i32
    %97 = tpu.memref_slice %arg9[%c2_i32_87, %c0_i32_88] : memref<8x256xf32, #tpu.memory_space<vmem>> -> memref<1x256xf32, #tpu.memory_space<vmem>>
    %98 = tpu.memref_slice %arg11[%c0_i32_84] : memref<2x!tpu.dma_semaphore, #tpu.memory_space<semaphore_mem>> -> memref<1x!tpu.dma_semaphore, #tpu.memory_space<semaphore_mem>>
    %99 = tpu.memref_squeeze %98 : memref<1x!tpu.dma_semaphore, #tpu.memory_space<semaphore_mem>> -> memref<!tpu.dma_semaphore, #tpu.memory_space<semaphore_mem>>
    tpu.wait_dma2 semaphore(%99 : memref<!tpu.dma_semaphore, #tpu.memory_space<semaphore_mem>>) src(%96 : memref<1x256xf32, #tpu.memory_space<any>>) dst(%97 : memref<1x256xf32, #tpu.memory_space<vmem>>)
    %c1_i32_89 = arith.constant 1 : i32
    %c0_i32_90 = arith.constant 0 : i32
    %c0_i32_91 = arith.constant 0 : i32
    %100 = tpu.memref_slice %arg4[%c0_i32_90, %c0_i32_91] : memref<16x256xf32, #tpu.memory_space<any>> -> memref<1x256xf32, #tpu.memory_space<any>>
    %c2_i32_92 = arith.constant 2 : i32
    %c0_i32_93 = arith.constant 0 : i32
    %101 = tpu.memref_slice %arg10[%c2_i32_92, %c0_i32_93] : memref<8x256xf32, #tpu.memory_space<vmem>> -> memref<1x256xf32, #tpu.memory_space<vmem>>
    %102 = tpu.memref_slice %arg11[%c1_i32_89] : memref<2x!tpu.dma_semaphore, #tpu.memory_space<semaphore_mem>> -> memref<1x!tpu.dma_semaphore, #tpu.memory_space<semaphore_mem>>
    %103 = tpu.memref_squeeze %102 : memref<1x!tpu.dma_semaphore, #tpu.memory_space<semaphore_mem>> -> memref<!tpu.dma_semaphore, #tpu.memory_space<semaphore_mem>>
    tpu.wait_dma2 semaphore(%103 : memref<!tpu.dma_semaphore, #tpu.memory_space<semaphore_mem>>) src(%100 : memref<1x256xf32, #tpu.memory_space<any>>) dst(%101 : memref<1x256xf32, #tpu.memory_space<vmem>>)
    %c0_i32_94 = arith.constant 0 : i32
    %c0_i32_95 = arith.constant 0 : i32
    %c0_i32_96 = arith.constant 0 : i32
    %104 = tpu.memref_slice %arg3[%c0_i32_95, %c0_i32_96] : memref<64x256xf32, #tpu.memory_space<any>> -> memref<1x256xf32, #tpu.memory_space<any>>
    %c3_i32_97 = arith.constant 3 : i32
    %c0_i32_98 = arith.constant 0 : i32
    %105 = tpu.memref_slice %arg9[%c3_i32_97, %c0_i32_98] : memref<8x256xf32, #tpu.memory_space<vmem>> -> memref<1x256xf32, #tpu.memory_space<vmem>>
    %106 = tpu.memref_slice %arg11[%c0_i32_94] : memref<2x!tpu.dma_semaphore, #tpu.memory_space<semaphore_mem>> -> memref<1x!tpu.dma_semaphore, #tpu.memory_space<semaphore_mem>>
    %107 = tpu.memref_squeeze %106 : memref<1x!tpu.dma_semaphore, #tpu.memory_space<semaphore_mem>> -> memref<!tpu.dma_semaphore, #tpu.memory_space<semaphore_mem>>
    tpu.wait_dma2 semaphore(%107 : memref<!tpu.dma_semaphore, #tpu.memory_space<semaphore_mem>>) src(%104 : memref<1x256xf32, #tpu.memory_space<any>>) dst(%105 : memref<1x256xf32, #tpu.memory_space<vmem>>)
    %c1_i32_99 = arith.constant 1 : i32
    %c0_i32_100 = arith.constant 0 : i32
    %c0_i32_101 = arith.constant 0 : i32
    %108 = tpu.memref_slice %arg4[%c0_i32_100, %c0_i32_101] : memref<16x256xf32, #tpu.memory_space<any>> -> memref<1x256xf32, #tpu.memory_space<any>>
    %c3_i32_102 = arith.constant 3 : i32
    %c0_i32_103 = arith.constant 0 : i32
    %109 = tpu.memref_slice %arg10[%c3_i32_102, %c0_i32_103] : memref<8x256xf32, #tpu.memory_space<vmem>> -> memref<1x256xf32, #tpu.memory_space<vmem>>
    %110 = tpu.memref_slice %arg11[%c1_i32_99] : memref<2x!tpu.dma_semaphore, #tpu.memory_space<semaphore_mem>> -> memref<1x!tpu.dma_semaphore, #tpu.memory_space<semaphore_mem>>
    %111 = tpu.memref_squeeze %110 : memref<1x!tpu.dma_semaphore, #tpu.memory_space<semaphore_mem>> -> memref<!tpu.dma_semaphore, #tpu.memory_space<semaphore_mem>>
    tpu.wait_dma2 semaphore(%111 : memref<!tpu.dma_semaphore, #tpu.memory_space<semaphore_mem>>) src(%108 : memref<1x256xf32, #tpu.memory_space<any>>) dst(%109 : memref<1x256xf32, #tpu.memory_space<vmem>>)
    %c0_i32_104 = arith.constant 0 : i32
    %c0_i32_105 = arith.constant 0 : i32
    %c0_i32_106 = arith.constant 0 : i32
    %112 = tpu.memref_slice %arg3[%c0_i32_105, %c0_i32_106] : memref<64x256xf32, #tpu.memory_space<any>> -> memref<1x256xf32, #tpu.memory_space<any>>
    %c4_i32_107 = arith.constant 4 : i32
    %c0_i32_108 = arith.constant 0 : i32
    %113 = tpu.memref_slice %arg9[%c4_i32_107, %c0_i32_108] : memref<8x256xf32, #tpu.memory_space<vmem>> -> memref<1x256xf32, #tpu.memory_space<vmem>>
    %114 = tpu.memref_slice %arg11[%c0_i32_104] : memref<2x!tpu.dma_semaphore, #tpu.memory_space<semaphore_mem>> -> memref<1x!tpu.dma_semaphore, #tpu.memory_space<semaphore_mem>>
    %115 = tpu.memref_squeeze %114 : memref<1x!tpu.dma_semaphore, #tpu.memory_space<semaphore_mem>> -> memref<!tpu.dma_semaphore, #tpu.memory_space<semaphore_mem>>
    tpu.wait_dma2 semaphore(%115 : memref<!tpu.dma_semaphore, #tpu.memory_space<semaphore_mem>>) src(%112 : memref<1x256xf32, #tpu.memory_space<any>>) dst(%113 : memref<1x256xf32, #tpu.memory_space<vmem>>)
    %c1_i32_109 = arith.constant 1 : i32
    %c0_i32_110 = arith.constant 0 : i32
    %c0_i32_111 = arith.constant 0 : i32
    %116 = tpu.memref_slice %arg4[%c0_i32_110, %c0_i32_111] : memref<16x256xf32, #tpu.memory_space<any>> -> memref<1x256xf32, #tpu.memory_space<any>>
    %c4_i32_112 = arith.constant 4 : i32
    %c0_i32_113 = arith.constant 0 : i32
    %117 = tpu.memref_slice %arg10[%c4_i32_112, %c0_i32_113] : memref<8x256xf32, #tpu.memory_space<vmem>> -> memref<1x256xf32, #tpu.memory_space<vmem>>
    %118 = tpu.memref_slice %arg11[%c1_i32_109] : memref<2x!tpu.dma_semaphore, #tpu.memory_space<semaphore_mem>> -> memref<1x!tpu.dma_semaphore, #tpu.memory_space<semaphore_mem>>
    %119 = tpu.memref_squeeze %118 : memref<1x!tpu.dma_semaphore, #tpu.memory_space<semaphore_mem>> -> memref<!tpu.dma_semaphore, #tpu.memory_space<semaphore_mem>>
    tpu.wait_dma2 semaphore(%119 : memref<!tpu.dma_semaphore, #tpu.memory_space<semaphore_mem>>) src(%116 : memref<1x256xf32, #tpu.memory_space<any>>) dst(%117 : memref<1x256xf32, #tpu.memory_space<vmem>>)
    %c0_i32_114 = arith.constant 0 : i32
    %c0_i32_115 = arith.constant 0 : i32
    %c0_i32_116 = arith.constant 0 : i32
    %120 = tpu.memref_slice %arg3[%c0_i32_115, %c0_i32_116] : memref<64x256xf32, #tpu.memory_space<any>> -> memref<1x256xf32, #tpu.memory_space<any>>
    %c5_i32_117 = arith.constant 5 : i32
    %c0_i32_118 = arith.constant 0 : i32
    %121 = tpu.memref_slice %arg9[%c5_i32_117, %c0_i32_118] : memref<8x256xf32, #tpu.memory_space<vmem>> -> memref<1x256xf32, #tpu.memory_space<vmem>>
    %122 = tpu.memref_slice %arg11[%c0_i32_114] : memref<2x!tpu.dma_semaphore, #tpu.memory_space<semaphore_mem>> -> memref<1x!tpu.dma_semaphore, #tpu.memory_space<semaphore_mem>>
    %123 = tpu.memref_squeeze %122 : memref<1x!tpu.dma_semaphore, #tpu.memory_space<semaphore_mem>> -> memref<!tpu.dma_semaphore, #tpu.memory_space<semaphore_mem>>
    tpu.wait_dma2 semaphore(%123 : memref<!tpu.dma_semaphore, #tpu.memory_space<semaphore_mem>>) src(%120 : memref<1x256xf32, #tpu.memory_space<any>>) dst(%121 : memref<1x256xf32, #tpu.memory_space<vmem>>)
    %c1_i32_119 = arith.constant 1 : i32
    %c0_i32_120 = arith.constant 0 : i32
    %c0_i32_121 = arith.constant 0 : i32
    %124 = tpu.memref_slice %arg4[%c0_i32_120, %c0_i32_121] : memref<16x256xf32, #tpu.memory_space<any>> -> memref<1x256xf32, #tpu.memory_space<any>>
    %c5_i32_122 = arith.constant 5 : i32
    %c0_i32_123 = arith.constant 0 : i32
    %125 = tpu.memref_slice %arg10[%c5_i32_122, %c0_i32_123] : memref<8x256xf32, #tpu.memory_space<vmem>> -> memref<1x256xf32, #tpu.memory_space<vmem>>
    %126 = tpu.memref_slice %arg11[%c1_i32_119] : memref<2x!tpu.dma_semaphore, #tpu.memory_space<semaphore_mem>> -> memref<1x!tpu.dma_semaphore, #tpu.memory_space<semaphore_mem>>
    %127 = tpu.memref_squeeze %126 : memref<1x!tpu.dma_semaphore, #tpu.memory_space<semaphore_mem>> -> memref<!tpu.dma_semaphore, #tpu.memory_space<semaphore_mem>>
    tpu.wait_dma2 semaphore(%127 : memref<!tpu.dma_semaphore, #tpu.memory_space<semaphore_mem>>) src(%124 : memref<1x256xf32, #tpu.memory_space<any>>) dst(%125 : memref<1x256xf32, #tpu.memory_space<vmem>>)
    %c0_i32_124 = arith.constant 0 : i32
    %c0_i32_125 = arith.constant 0 : i32
    %c0_i32_126 = arith.constant 0 : i32
    %128 = tpu.memref_slice %arg3[%c0_i32_125, %c0_i32_126] : memref<64x256xf32, #tpu.memory_space<any>> -> memref<1x256xf32, #tpu.memory_space<any>>
    %c6_i32_127 = arith.constant 6 : i32
    %c0_i32_128 = arith.constant 0 : i32
    %129 = tpu.memref_slice %arg9[%c6_i32_127, %c0_i32_128] : memref<8x256xf32, #tpu.memory_space<vmem>> -> memref<1x256xf32, #tpu.memory_space<vmem>>
    %130 = tpu.memref_slice %arg11[%c0_i32_124] : memref<2x!tpu.dma_semaphore, #tpu.memory_space<semaphore_mem>> -> memref<1x!tpu.dma_semaphore, #tpu.memory_space<semaphore_mem>>
    %131 = tpu.memref_squeeze %130 : memref<1x!tpu.dma_semaphore, #tpu.memory_space<semaphore_mem>> -> memref<!tpu.dma_semaphore, #tpu.memory_space<semaphore_mem>>
    tpu.wait_dma2 semaphore(%131 : memref<!tpu.dma_semaphore, #tpu.memory_space<semaphore_mem>>) src(%128 : memref<1x256xf32, #tpu.memory_space<any>>) dst(%129 : memref<1x256xf32, #tpu.memory_space<vmem>>)
    %c1_i32_129 = arith.constant 1 : i32
    %c0_i32_130 = arith.constant 0 : i32
    %c0_i32_131 = arith.constant 0 : i32
    %132 = tpu.memref_slice %arg4[%c0_i32_130, %c0_i32_131] : memref<16x256xf32, #tpu.memory_space<any>> -> memref<1x256xf32, #tpu.memory_space<any>>
    %c6_i32_132 = arith.constant 6 : i32
    %c0_i32_133 = arith.constant 0 : i32
    %133 = tpu.memref_slice %arg10[%c6_i32_132, %c0_i32_133] : memref<8x256xf32, #tpu.memory_space<vmem>> -> memref<1x256xf32, #tpu.memory_space<vmem>>
    %134 = tpu.memref_slice %arg11[%c1_i32_129] : memref<2x!tpu.dma_semaphore, #tpu.memory_space<semaphore_mem>> -> memref<1x!tpu.dma_semaphore, #tpu.memory_space<semaphore_mem>>
    %135 = tpu.memref_squeeze %134 : memref<1x!tpu.dma_semaphore, #tpu.memory_space<semaphore_mem>> -> memref<!tpu.dma_semaphore, #tpu.memory_space<semaphore_mem>>
    tpu.wait_dma2 semaphore(%135 : memref<!tpu.dma_semaphore, #tpu.memory_space<semaphore_mem>>) src(%132 : memref<1x256xf32, #tpu.memory_space<any>>) dst(%133 : memref<1x256xf32, #tpu.memory_space<vmem>>)
    %c0_i32_134 = arith.constant 0 : i32
    %c0_i32_135 = arith.constant 0 : i32
    %c0_i32_136 = arith.constant 0 : i32
    %136 = tpu.memref_slice %arg3[%c0_i32_135, %c0_i32_136] : memref<64x256xf32, #tpu.memory_space<any>> -> memref<1x256xf32, #tpu.memory_space<any>>
    %c7_i32_137 = arith.constant 7 : i32
    %c0_i32_138 = arith.constant 0 : i32
    %137 = tpu.memref_slice %arg9[%c7_i32_137, %c0_i32_138] : memref<8x256xf32, #tpu.memory_space<vmem>> -> memref<1x256xf32, #tpu.memory_space<vmem>>
    %138 = tpu.memref_slice %arg11[%c0_i32_134] : memref<2x!tpu.dma_semaphore, #tpu.memory_space<semaphore_mem>> -> memref<1x!tpu.dma_semaphore, #tpu.memory_space<semaphore_mem>>
    %139 = tpu.memref_squeeze %138 : memref<1x!tpu.dma_semaphore, #tpu.memory_space<semaphore_mem>> -> memref<!tpu.dma_semaphore, #tpu.memory_space<semaphore_mem>>
    tpu.wait_dma2 semaphore(%139 : memref<!tpu.dma_semaphore, #tpu.memory_space<semaphore_mem>>) src(%136 : memref<1x256xf32, #tpu.memory_space<any>>) dst(%137 : memref<1x256xf32, #tpu.memory_space<vmem>>)
    %c1_i32_139 = arith.constant 1 : i32
    %c0_i32_140 = arith.constant 0 : i32
    %c0_i32_141 = arith.constant 0 : i32
    %140 = tpu.memref_slice %arg4[%c0_i32_140, %c0_i32_141] : memref<16x256xf32, #tpu.memory_space<any>> -> memref<1x256xf32, #tpu.memory_space<any>>
    %c7_i32_142 = arith.constant 7 : i32
    %c0_i32_143 = arith.constant 0 : i32
    %141 = tpu.memref_slice %arg10[%c7_i32_142, %c0_i32_143] : memref<8x256xf32, #tpu.memory_space<vmem>> -> memref<1x256xf32, #tpu.memory_space<vmem>>
    %142 = tpu.memref_slice %arg11[%c1_i32_139] : memref<2x!tpu.dma_semaphore, #tpu.memory_space<semaphore_mem>> -> memref<1x!tpu.dma_semaphore, #tpu.memory_space<semaphore_mem>>
    %143 = tpu.memref_squeeze %142 : memref<1x!tpu.dma_semaphore, #tpu.memory_space<semaphore_mem>> -> memref<!tpu.dma_semaphore, #tpu.memory_space<semaphore_mem>>
    tpu.wait_dma2 semaphore(%143 : memref<!tpu.dma_semaphore, #tpu.memory_space<semaphore_mem>>) src(%140 : memref<1x256xf32, #tpu.memory_space<any>>) dst(%141 : memref<1x256xf32, #tpu.memory_space<vmem>>)
    %c0_144 = arith.constant 0 : index
    %c0_145 = arith.constant 0 : index
    %144 = vector.load %arg9[%c0_144, %c0_145] : memref<8x256xf32, #tpu.memory_space<vmem>>, vector<8x256xf32>
    %c0_146 = arith.constant 0 : index
    %c0_147 = arith.constant 0 : index
    %145 = vector.load %arg10[%c0_146, %c0_147] : memref<8x256xf32, #tpu.memory_space<vmem>>, vector<8x256xf32>
    %146 = arith.addf %144, %145 : vector<8x256xf32>
    %147 = arith.truncf %146 : vector<8x256xf32> to vector<8x256xbf16>
    %c0_148 = arith.constant 0 : index
    %c0_149 = arith.constant 0 : index
    %148 = vector.load %arg5[%c0_148, %c0_149] : memref<256x128xbf16, #tpu.memory_space<vmem>>, vector<256x128xbf16>
    %cst = arith.constant dense<0.000000e+00> : vector<8x128xf32>
    %149 = tpu.matmul %147, %148, %cst {dimension_numbers = #tpu.dot_dimension_numbers<[1], [0], [0], [1], [0, 0, 1, 1], [], []>} : vector<8x256xbf16>, vector<256x128xbf16>, vector<8x128xf32> -> vector<8x128xf32>
    %c0_150 = arith.constant 0 : index
    %c0_151 = arith.constant 0 : index
    %150 = vector.load %arg6[%c0_150, %c0_151] : memref<1x128xf32, #tpu.memory_space<vmem>>, vector<1x128xf32>
    %151 = vector.broadcast %150 : vector<1x128xf32> to vector<8x128xf32>
    %152 = arith.addf %149, %151 : vector<8x128xf32>
    %153 = math.tanh %152 : vector<8x128xf32>
    %c0_152 = arith.constant 0 : index
    %c0_153 = arith.constant 0 : index
    %154 = vector.load %arg7[%c0_152, %c0_153] : memref<8x1xf32, #tpu.memory_space<vmem>>, vector<8x1xf32>
    %155 = vector.broadcast %154 : vector<8x1xf32> to vector<8x128xf32>
    %156 = arith.mulf %153, %155 : vector<8x128xf32>
    %c0_154 = arith.constant 0 : index
    %c0_155 = arith.constant 0 : index
    %157 = vector.load %arg8[%c0_154, %c0_155] : memref<8x128xf32, #tpu.memory_space<vmem>>, vector<8x128xf32>
    tpu.vector_store %arg8[%c0_154, %c0_155], %156 {strides = array<i32>} : memref<8x128xf32, #tpu.memory_space<vmem>>, vector<8x128xf32>,
    return
  }
  func.func @transform_2(%arg0: i32, %arg1: memref<8xi32, #tpu.memory_space<smem>>, %arg2: memref<8xi32, #tpu.memory_space<smem>>) -> (i32, i32) {
    %c0_i32 = arith.constant 0 : i32
    %c0_i32_0 = arith.constant 0 : i32
    return %c0_i32, %arg0 : i32, i32
  }
  func.func @transform_3(%arg0: i32, %arg1: memref<8xi32, #tpu.memory_space<smem>>, %arg2: memref<8xi32, #tpu.memory_space<smem>>) -> (i32, i32) {
    %c0_i32 = arith.constant 0 : i32
    %c0_i32_0 = arith.constant 0 : i32
    return %c0_i32, %arg0 : i32, i32
  }
  func.func @transform_4(%arg0: i32, %arg1: memref<8xi32, #tpu.memory_space<smem>>, %arg2: memref<8xi32, #tpu.memory_space<smem>>) -> (i32, i32) {
    %c0_i32 = arith.constant 0 : i32
    %c0_i32_0 = arith.constant 0 : i32
    %c0_i32_1 = arith.constant 0 : i32
    return %c0_i32, %c0_i32_0 : i32, i32
  }
  func.func @transform_5(%arg0: i32, %arg1: memref<8xi32, #tpu.memory_space<smem>>, %arg2: memref<8xi32, #tpu.memory_space<smem>>) -> (i32, i32) {
    %c0_i32 = arith.constant 0 : i32
    %c0_i32_0 = arith.constant 0 : i32
    return %c0_i32, %arg0 : i32, i32
  }
}

</mosaic_0001>

<bundles_post_ra>
// kernel: _forward_impl.1
= control target key start
LH: loop header
LB: loop body
LE: loop exit
PB: predicated region body
PF: predicated region fallthrough
CT: control target
= control target key end

     0   :  { %s1723_s30 = smov [#allocation6]   ;;  %s1724_s8 = smov [#allocation7]   ;;  %s1978_s0 = inlined_call_operand.vmem [shape: s32[8], index: 0, kind: input, shape index: {}]   ;;  %s1979_s2 = inlined_call_operand.vmem [shape: f32[64,256], index: 2, kind: input, shape index: {}]   ;;  %s1980_s3 = inlined_call_operand.vmem [shape: f32[16,256], index: 3, kind: input, shape index: {}]   ;;  %s1981_s4 = inlined_call_operand.vmem [shape: bf16[256,256], index: 4, kind: input, shape index: {}]   ;;  %s1982_s5 = inlined_call_operand.vmem [shape: f32[1,256], index: 5, kind: input, shape index: {}]   ;;  %s1983_s6 = inlined_call_operand.vmem [shape: f32[8,1], index: 6, kind: input, shape index: {}]   ;;  %s1984_s7 = inlined_call_operand.vmem [shape: f32[8,256], index: 7, kind: output, shape index: {}]   ;;  %s1985_s1 = inlined_call_operand.vmem [shape: s32[8], index: 1, kind: input, shape index: {}]  }
   0x1   :  { %s13_s26 = sshll.u32 %s1978_s0, 4  ;;  %s18_s29 = sshll.u32 %s1985_s1, 4  ;;  %s14_s26 = int_to_ptr.vmem [resolvable:$true] %s13_s26  ;;  %s19_s29 = int_to_ptr.vmem [resolvable:$true] %s18_s29 }
   0x2   :  { %16 = dma.vmem_to_smem %s14_s26, 16, %s1723_s30, [#allocation5] }
   0x3   :  { %21 = dma.vmem_to_smem %s19_s29, 16, %s1724_s8, [#allocation5] }
   0x4   :  { %1677 = dma.done.wait [#allocation5], 32 }
   0x5   :  { %1678 = vsyncadd [#allocation5], 4294967264 }
   0x6   :  { %24 = sfence }
   0x7   :  { %s1772_s9 = smov 0   ;;  %s1774_s10 = smov 0  }
   0x8   :  { %s1776_s11 = smov 0  }
   0x9 LB: > { %s1487_s0 = sadd.s32 4294967295, %s1721_s11   ;;  %s1789_s1 = sadd.s32 1, %s1721_s11   ;;  %s1721_s11 = sphi %s1776_s11, %s1988_s11   ;;  %s1717_s10 = sphi %s1774_s10, %s1987_s10   ;;  %s1713_s9 = sphi %s1772_s9, %s1986_s9  }
   0xa   : > { %s34_s12 = ssub.s32 %s1721_s11, %s1789_s1  ;;  %s37_s13 = sadd.s32 1, %s1717_s10 }
   0xb   : > { %p35_p0 = scmp.eq.s32.totalorder %s34_s12, 0  ;;  %p44_p1 = scmp.ne.s32.totalorder %s1717_s10, %s1713_s9 }
   0xc   : > { %p45_p2 = scmp.eq.s32.totalorder %s1721_s11, 0  ;;  %p1490_p4 = scmp.ge.s32.totalorder %s1721_s11, 2 }
   0xd   : > { %s1798_s14 = scalar_select %p35_p0, %s1717_s10, %s37_s13  }
   0xe   : > { %p46_p3 = por %p45_p2, %p44_p1  ;;  %146 = sbr.rel (%p1490_p4) target bundleno = 55 (0x37), region = 20 }
  0x13   : > { %149 = sbr.rel (!%p46_p3) target bundleno = 55 (0x37), region = 24  ;;  %s151_s15 = sand.u32 (%p46_p3), 1, %s1717_s10  }
  0x14   : > { %s1492_s16 = sshll.u32 (%p46_p3), %s1721_s11, 2  ;;  %s1491_s17 = sshll.u32 (%p46_p3), %s151_s15, 7 }
  0x15   : > { %s1806_s20 = scalar_lea.vmem (%p46_p3), %s1981_s4, %s1492_s16  ;;  %s1810_s21 = scalar_lea.vmem (%p46_p3), [#allocation8], %s1491_s17 }
  0x16   : > { %v172_v0 = vld [vmem:[%s1806_s20] sm:$0xf] (%p46_p3)  ;;  %v174_v1 = vld [vmem:[%s1806_s20 + $0x8] sm:$0xf] (%p46_p3)  ;;  %v176_v2 = vld [vmem:[%s1806_s20 + $0x10] sm:$0xf] (%p46_p3) }
  0x17   : > { %173 = vst [vmem:[%s1810_s21] sm:$0xf] (%p46_p3), %v172_v0  ;;  %v178_v3 = vld [vmem:[%s1806_s20 + $0x18] sm:$0xf] (%p46_p3)  ;;  %v180_v4 = vld [vmem:[%s1806_s20 + $0x20] sm:$0xf] (%p46_p3) }
  0x18   : > { %175 = vst [vmem:[%s1810_s21 + $0x4] sm:$0xf] %v174_v1  ;;  %v182_v5 = vld [vmem:[%s1806_s20 + $0x28] sm:$0xf]  ;;  %v184_v6 = vld [vmem:[%s1806_s20 + $0x30] sm:$0xf] }
  0x19   : > { %177 = vst [vmem:[%s1810_s21 + $0x8] sm:$0xf] %v176_v2  ;;  %v186_v7 = vld [vmem:[%s1806_s20 + $0x38] sm:$0xf]  ;;  %v188_v8 = vld [vmem:[%s1806_s20 + $0x40] sm:$0xf] }
  0x1a   : > { %179 = vst [vmem:[%s1810_s21 + $0xc] sm:$0xf] %v178_v3  ;;  %v190_v9 = vld [vmem:[%s1806_s20 + $0x48] sm:$0xf]  ;;  %v192_v10 = vld [vmem:[%s1806_s20 + $0x50] sm:$0xf] }
  0x1b   : > { %181 = vst [vmem:[%s1810_s21 + $0x10] sm:$0xf] %v180_v4  ;;  %v194_v11 = vld [vmem:[%s1806_s20 + $0x58] sm:$0xf]  ;;  %v196_v12 = vld [vmem:[%s1806_s20 + $0x60] sm:$0xf] }
  0x1c   : > { %183 = vst [vmem:[%s1810_s21 + $0x14] sm:$0xf] %v182_v5  ;;  %v198_v13 = vld [vmem:[%s1806_s20 + $0x68] sm:$0xf]  ;;  %v200_v14 = vld [vmem:[%s1806_s20 + $0x70] sm:$0xf] }
  0x1d   : > { %185 = vst [vmem:[%s1810_s21 + $0x18] sm:$0xf] %v184_v6  ;;  %v202_v15 = vld [vmem:[%s1806_s20 + $0x78] sm:$0xf]  ;;  %v204_v16 = vld [vmem:[%s1806_s20 + $0x80] sm:$0xf] }
  0x1e   : > { %187 = vst [vmem:[%s1810_s21 + $0x1c] sm:$0xf] %v186_v7  ;;  %v206_v17 = vld [vmem:[%s1806_s20 + $0x88] sm:$0xf]  ;;  %v208_v18 = vld [vmem:[%s1806_s20 + $0x90] sm:$0xf] }
  0x1f   : > { %189 = vst [vmem:[%s1810_s21 + $0x20] sm:$0xf] %v188_v8  ;;  %v210_v19 = vld [vmem:[%s1806_s20 + $0x98] sm:$0xf]  ;;  %v212_v20 = vld [vmem:[%s1806_s20 + $0xa0] sm:$0xf] }
  0x20   : > { %191 = vst [vmem:[%s1810_s21 + $0x24] sm:$0xf] %v190_v9  ;;  %v214_v21 = vld [vmem:[%s1806_s20 + $0xa8] sm:$0xf]  ;;  %v216_v22 = vld [vmem:[%s1806_s20 + $0xb0] sm:$0xf] }
  0x21   : > { %193 = vst [vmem:[%s1810_s21 + $0x28] sm:$0xf] %v192_v10  ;;  %v218_v23 = vld [vmem:[%s1806_s20 + $0xb8] sm:$0xf]  ;;  %v220_v24 = vld [vmem:[%s1806_s20 + $0xc0] sm:$0xf] }
  0x22   : > { %195 = vst [vmem:[%s1810_s21 + $0x2c] sm:$0xf] %v194_v11  ;;  %v222_v25 = vld [vmem:[%s1806_s20 + $0xc8] sm:$0xf]  ;;  %v224_v26 = vld [vmem:[%s1806_s20 + $0xd0] sm:$0xf] }
  0x23   : > { %197 = vst [vmem:[%s1810_s21 + $0x30] sm:$0xf] %v196_v12  ;;  %v226_v27 = vld [vmem:[%s1806_s20 + $0xd8] sm:$0xf]  ;;  %v228_v28 = vld [vmem:[%s1806_s20 + $0xe0] sm:$0xf] }
  0x24   : > { %199 = vst [vmem:[%s1810_s21 + $0x34] sm:$0xf] %v198_v13  ;;  %v230_v29 = vld [vmem:[%s1806_s20 + $0xe8] sm:$0xf]  ;;  %v232_v30 = vld [vmem:[%s1806_s20 + $0xf0] sm:$0xf] }
  0x25   : > { %201 = vst [vmem:[%s1810_s21 + $0x38] sm:$0xf] %v200_v14  ;;  %v234_v31 = vld [vmem:[%s1806_s20 + $0xf8] sm:$0xf] }
  0x26   : > { %203 = vst [vmem:[%s1810_s21 + $0x3c] sm:$0xf] %v202_v15 }
  0x27   : > { %205 = vst [vmem:[%s1810_s21 + $0x40] sm:$0xf] %v204_v16 }
  0x28   : > { %207 = vst [vmem:[%s1810_s21 + $0x44] sm:$0xf] %v206_v17 }
  0x29   : > { %209 = vst [vmem:[%s1810_s21 + $0x48] sm:$0xf] %v208_v18 }
  0x2a   : > { %211 = vst [vmem:[%s1810_s21 + $0x4c] sm:$0xf] %v210_v19 }
  0x2b   : > { %213 = vst [vmem:[%s1810_s21 + $0x50] sm:$0xf] %v212_v20 }
  0x2c   : > { %215 = vst [vmem:[%s1810_s21 + $0x54] sm:$0xf] %v214_v21 }
  0x2d   : > { %217 = vst [vmem:[%s1810_s21 + $0x58] sm:$0xf] %v216_v22 }
  0x2e   : > { %219 = vst [vmem:[%s1810_s21 + $0x5c] sm:$0xf] %v218_v23 }
  0x2f   : > { %221 = vst [vmem:[%s1810_s21 + $0x60] sm:$0xf] %v220_v24 }
  0x30   : > { %223 = vst [vmem:[%s1810_s21 + $0x64] sm:$0xf] %v222_v25 }
  0x31   : > { %225 = vst [vmem:[%s1810_s21 + $0x68] sm:$0xf] %v224_v26 }
  0x32   : > { %227 = vst [vmem:[%s1810_s21 + $0x6c] sm:$0xf] %v226_v27 }
  0x33   : > { %229 = vst [vmem:[%s1810_s21 + $0x70] sm:$0xf] %v228_v28 }
  0x34   : > { %231 = vst [vmem:[%s1810_s21 + $0x74] sm:$0xf] %v230_v29 }
  0x35   : > { %233 = vst [vmem:[%s1810_s21 + $0x78] sm:$0xf] %v232_v30 }
  0x36   : > { %235 = vst [vmem:[%s1810_s21 + $0x7c] sm:$0xf] %v234_v31 }
  0x37 PF: > { %p1493_p5 = scmp.ge.s32.totalorder %s1721_s11, 1  ;;  %p328_p6 = scmp.lt.s32.totalorder %s1721_s11, 3 }
  0x39   : > { %p329_p7 = pnand %p1493_p5, %p328_p6 }
  0x3a   : > { %s335_s22 = sand.u32 (!%p329_p7), 1, %s1713_s9   ;;  %p360_p8 = scmp.lt.s32.totalorder (!%p329_p7), %s1487_s0, 1 }
  0x3b   : > { %332 = sbr.rel (%p329_p7) target bundleno = 472 (0x1d8), region = 69  ;;  %s1494_s23 = sshll.u32 (!%p329_p7), %s335_s22, 7 }
  0x3c   : > { %s367_s24 = sld [smem:[#allocation6]] (!%p329_p7)  ;;  %s1896_s18 = scalar_lea.vmem (!%p329_p7), [#allocation8], %s1494_s23 }
  0x40   : > { %s1990_s0 = smov (!%p360_p8, %s1487_s0), 1 }
  0x41   : > { %s362_s27 = scalar_lea.vmem %s1982_s5, %s1990_s0  ;;  %s1495_s28 = sshll.u32 %s1990_s0, 3 }
  0x42   : > { %s1891_s8 = scalar_lea.vmem %s1984_s7, %s1495_s28  ;;  %s368_s9 = sshrl.u32 %s367_s24, 3 }
  0x43   : > { %s369_s12 = sand.u32 7, %s367_s24   ;;  %s1496_s13 = sshll.u32 %s368_s9, 4 }
  0x44   : > { %s371_s15 = sadd.s32 %s1496_s13, %s369_s12 }
  0x45   : > { %s372_s17 = scalar_lea.vmem %s1979_s2, %s371_s15 }
  0x46   : > { %v387_v32 = vld [vmem:[%s372_s17] sm:$0x1]  ;;  %v389_v33 = vld [vmem:[%s372_s17 + $0x8] sm:$0x1] }
  0x47   : > { %388 = vst [vmem:[#allocation2] sm:$0x1] %v387_v32 }
  0x48   : > { %390 = vst [vmem:[#allocation2 + $0x8] sm:$0x1] %v389_v33 }
  0x49   : > { %410 = vsyncadd [#allocation4], 32  ;;  %s411_s19 = sld [smem:[#allocation7]] }
  0x4f   : > { %s412_s20 = sshrl.u32 %s411_s19, 3  ;;  %s413_s21 = sand.u32 7, %s411_s19  }
  0x50   : > { %s1497_s22 = sshll.u32 %s412_s20, 4 }
  0x51   : > { %s415_s25 = sadd.s32 %s1497_s22, %s413_s21 }
  0x52   : > { %s416_s28 = scalar_lea.vmem %s1980_s3, %s415_s25 }
  0x53   : > { %v432_v34 = vld [vmem:[%s416_s28] sm:$0x1]  ;;  %v434_v35 = vld [vmem:[%s416_s28 + $0x8] sm:$0x1] }
  0x54   : > { %433 = vst [vmem:[#allocation3] sm:$0x1] %v432_v34 }
  0x55   : > { %435 = vst [vmem:[#allocation3 + $0x8] sm:$0x1] %v434_v35 }
  0x56   : > { %455 = vsyncadd [#allocation4 + $0x1], 32  ;;  %s1498_s29 = sld [smem:[#allocation6 + $0x1]] }
  0x5c   : > { %s457_s30 = sshrl.u32 %s1498_s29, 3  ;;  %s458_s9 = sand.u32 7, %s1498_s29  }
  0x5d   : > { %s1499_s23 = sshll.u32 %s457_s30, 4 }
  0x5e   : > { %s460_s12 = sadd.s32 %s1499_s23, %s458_s9 }
  0x5f   : > { %s461_s16 = scalar_lea.vmem %s1979_s2, %s460_s12 }
  0x60   : > { %v477_v36 = vld [vmem:[%s461_s16] sm:$0x1]  ;;  %v479_v37 = vld [vmem:[%s461_s16 + $0x8] sm:$0x1] }
  0x61   : > { %478 = vst [vmem:[#allocation2 + $0x1] sm:$0x1] %v477_v36 }
  0x62   : > { %480 = vst [vmem:[#allocation2 + $0x9] sm:$0x1] %v479_v37 }
  0x63   : > { %500 = vsyncadd [#allocation4], 32  ;;  %s1500_s11 = sld [smem:[#allocation7 + $0x1]] }
  0x69   : > { %s502_s17 = sshrl.u32 %s1500_s11, 3  ;;  %s503_s19 = sand.u32 7, %s1500_s11  }
  0x6a   : > { %s1501_s20 = sshll.u32 %s502_s17, 4 }
  0x6b   : > { %s505_s21 = sadd.s32 %s1501_s20, %s503_s19 }
  0x6c   : > { %s506_s26 = scalar_lea.vmem %s1980_s3, %s505_s21 }
  0x6d   : > { %v522_v38 = vld [vmem:[%s506_s26] sm:$0x1]  ;;  %v524_v39 = vld [vmem:[%s506_s26 + $0x8] sm:$0x1] }
  0x6e   : > { %523 = vst [vmem:[#allocation3 + $0x1] sm:$0x1] %v522_v38 }
  0x6f   : > { %525 = vst [vmem:[#allocation3 + $0x9] sm:$0x1] %v524_v39 }
  0x70   : > { %545 = vsyncadd [#allocation4 + $0x1], 32  ;;  %s1502_s24 = sld [smem:[#allocation6 + $0x2]] }
  0x76   : > { %s547_s28 = sshrl.u32 %s1502_s24, 3  ;;  %s548_s29 = sand.u32 7, %s1502_s24  }
  0x77   : > { %s1503_s30 = sshll.u32 %s547_s28, 4 }
  0x78   : > { %s550_s9 = sadd.s32 %s1503_s30, %s548_s29 }
  0x79   : > { %s551_s13 = scalar_lea.vmem %s1979_s2, %s550_s9 }
  0x7a   : > { %v567_v40 = vld [vmem:[%s551_s13] sm:$0x1]  ;;  %v569_v41 = vld [vmem:[%s551_s13 + $0x8] sm:$0x1] }
  0x7b   : > { %568 = vst [vmem:[#allocation2 + $0x2] sm:$0x1] %v567_v40 }
  0x7c   : > { %570 = vst [vmem:[#allocation2 + $0xa] sm:$0x1] %v569_v41 }
  0x7d   : > { %590 = vsyncadd [#allocation4], 32  ;;  %s1504_s15 = sld [smem:[#allocation7 + $0x2]] }
  0x83   : > { %s592_s16 = sshrl.u32 %s1504_s15, 3  ;;  %s593_s11 = sand.u32 7, %s1504_s15  }
  0x84   : > { %s1505_s17 = sshll.u32 %s592_s16, 4 }
  0x85   : > { %s595_s19 = sadd.s32 %s1505_s17, %s593_s11 }
  0x86   : > { %s596_s22 = scalar_lea.vmem %s1980_s3, %s595_s19 }
  0x87   : > { %v612_v42 = vld [vmem:[%s596_s22] sm:$0x1]  ;;  %v614_v43 = vld [vmem:[%s596_s22 + $0x8] sm:$0x1] }
  0x88   : > { %613 = vst [vmem:[#allocation3 + $0x2] sm:$0x1] %v612_v42 }
  0x89   : > { %615 = vst [vmem:[#allocation3 + $0xa] sm:$0x1] %v614_v43 }
  0x8a   : > { %635 = vsyncadd [#allocation4 + $0x1], 32  ;;  %s1506_s25 = sld [smem:[#allocation6 + $0x3]] }
  0x90   : > { %s637_s26 = sshrl.u32 %s1506_s25, 3  ;;  %s638_s24 = sand.u32 7, %s1506_s25  }
  0x91   : > { %s1507_s28 = sshll.u32 %s637_s26, 4 }
  0x92   : > { %s640_s29 = sadd.s32 %s1507_s28, %s638_s24 }
  0x93   : > { %s641_s23 = scalar_lea.vmem %s1979_s2, %s640_s29 }
  0x94   : > { %v657_v44 = vld [vmem:[%s641_s23] sm:$0x1]  ;;  %v659_v45 = vld [vmem:[%s641_s23 + $0x8] sm:$0x1] }
  0x95   : > { %658 = vst [vmem:[#allocation2 + $0x3] sm:$0x1] %v657_v44 }
  0x96   : > { %660 = vst [vmem:[#allocation2 + $0xb] sm:$0x1] %v659_v45 }
  0x97   : > { %680 = vsyncadd [#allocation4], 32  ;;  %s1508_s12 = sld [smem:[#allocation7 + $0x3]] }
  0x9d   : > { %s682_s13 = sshrl.u32 %s1508_s12, 3  ;;  %s683_s15 = sand.u32 7, %s1508_s12  }
  0x9e   : > { %s1509_s16 = sshll.u32 %s682_s13, 4 }
  0x9f   : > { %s685_s11 = sadd.s32 %s1509_s16, %s683_s15 }
  0xa0   : > { %s686_s20 = scalar_lea.vmem %s1980_s3, %s685_s11 }
  0xa1   : > { %v702_v46 = vld [vmem:[%s686_s20] sm:$0x1]  ;;  %v704_v47 = vld [vmem:[%s686_s20 + $0x8] sm:$0x1] }
  0xa2   : > { %703 = vst [vmem:[#allocation3 + $0x3] sm:$0x1] %v702_v46 }
  0xa3   : > { %705 = vst [vmem:[#allocation3 + $0xb] sm:$0x1] %v704_v47 }
  0xa4   : > { %725 = vsyncadd [#allocation4 + $0x1], 32  ;;  %s1510_s21 = sld [smem:[#allocation6 + $0x4]] }
  0xaa   : > { %s727_s22 = sshrl.u32 %s1510_s21, 3  ;;  %s728_s25 = sand.u32 7, %s1510_s21  }
  0xab   : > { %s1511_s26 = sshll.u32 %s727_s22, 4 }
  0xac   : > { %s730_s24 = sadd.s32 %s1511_s26, %s728_s25 }
  0xad   : > { %s731_s30 = scalar_lea.vmem %s1979_s2, %s730_s24 }
  0xae   : > { %v747_v48 = vld [vmem:[%s731_s30] sm:$0x1]  ;;  %v749_v49 = vld [vmem:[%s731_s30 + $0x8] sm:$0x1] }
  0xaf   : > { %748 = vst [vmem:[#allocation2 + $0x4] sm:$0x1] %v747_v48 }
  0xb0   : > { %750 = vst [vmem:[#allocation2 + $0xc] sm:$0x1] %v749_v49 }
  0xb1   : > { %770 = vsyncadd [#allocation4], 32  ;;  %s1512_s9 = sld [smem:[#allocation7 + $0x4]] }
  0xb7   : > { %s772_s23 = sshrl.u32 %s1512_s9, 3  ;;  %s773_s12 = sand.u32 7, %s1512_s9  }
  0xb8   : > { %s1513_s13 = sshll.u32 %s772_s23, 4 }
  0xb9   : > { %s775_s15 = sadd.s32 %s1513_s13, %s773_s12 }
  0xba   : > { %s776_s17 = scalar_lea.vmem %s1980_s3, %s775_s15 }
  0xbb   : > { %v792_v50 = vld [vmem:[%s776_s17] sm:$0x1]  ;;  %v794_v51 = vld [vmem:[%s776_s17 + $0x8] sm:$0x1] }
  0xbc   : > { %793 = vst [vmem:[#allocation3 + $0x4] sm:$0x1] %v792_v50 }
  0xbd   : > { %795 = vst [vmem:[#allocation3 + $0xc] sm:$0x1] %v794_v51 }
  0xbe   : > { %815 = vsyncadd [#allocation4 + $0x1], 32  ;;  %s1514_s19 = sld [smem:[#allocation6 + $0x5]] }
  0xc4   : > { %s817_s20 = sshrl.u32 %s1514_s19, 3  ;;  %s818_s21 = sand.u32 7, %s1514_s19  }
  0xc5   : > { %s1515_s22 = sshll.u32 %s817_s20, 4 }
  0xc6   : > { %s820_s25 = sadd.s32 %s1515_s22, %s818_s21 }
  0xc7   : > { %s821_s28 = scalar_lea.vmem %s1979_s2, %s820_s25 }
  0xc8   : > { %v837_v52 = vld [vmem:[%s821_s28] sm:$0x1]  ;;  %v839_v53 = vld [vmem:[%s821_s28 + $0x8] sm:$0x1] }
  0xc9   : > { %838 = vst [vmem:[#allocation2 + $0x5] sm:$0x1] %v837_v52 }
  0xca   : > { %840 = vst [vmem:[#allocation2 + $0xd] sm:$0x1] %v839_v53 }
  0xcb   : > { %860 = vsyncadd [#allocation4], 32  ;;  %s1516_s29 = sld [smem:[#allocation7 + $0x5]] }
  0xd1   : > { %s862_s30 = sshrl.u32 %s1516_s29, 3  ;;  %s863_s9 = sand.u32 7, %s1516_s29  }
  0xd2   : > { %s1517_s23 = sshll.u32 %s862_s30, 4 }
  0xd3   : > { %s865_s12 = sadd.s32 %s1517_s23, %s863_s9 }
  0xd4   : > { %s866_s16 = scalar_lea.vmem %s1980_s3, %s865_s12 }
  0xd5   : > { %v882_v54 = vld [vmem:[%s866_s16] sm:$0x1]  ;;  %v884_v55 = vld [vmem:[%s866_s16 + $0x8] sm:$0x1] }
  0xd6   : > { %883 = vst [vmem:[#allocation3 + $0x5] sm:$0x1] %v882_v54 }
  0xd7   : > { %885 = vst [vmem:[#allocation3 + $0xd] sm:$0x1] %v884_v55 }
  0xd8   : > { %905 = vsyncadd [#allocation4 + $0x1], 32  ;;  %s1518_s11 = sld [smem:[#allocation6 + $0x6]] }
  0xde   : > { %s907_s17 = sshrl.u32 %s1518_s11, 3  ;;  %s908_s19 = sand.u32 7, %s1518_s11  }
  0xdf   : > { %s1519_s20 = sshll.u32 %s907_s17, 4 }
  0xe0   : > { %s910_s21 = sadd.s32 %s1519_s20, %s908_s19 }
  0xe1   : > { %s911_s26 = scalar_lea.vmem %s1979_s2, %s910_s21 }
  0xe2   : > { %v927_v56 = vld [vmem:[%s911_s26] sm:$0x1]  ;;  %v929_v57 = vld [vmem:[%s911_s26 + $0x8] sm:$0x1] }
  0xe3   : > { %928 = vst [vmem:[#allocation2 + $0x6] sm:$0x1] %v927_v56 }
  0xe4   : > { %930 = vst [vmem:[#allocation2 + $0xe] sm:$0x1] %v929_v57 }
  0xe5   : > { %950 = vsyncadd [#allocation4], 32  ;;  %s1520_s24 = sld [smem:[#allocation7 + $0x6]] }
  0xeb   : > { %s952_s28 = sshrl.u32 %s1520_s24, 3  ;;  %s953_s29 = sand.u32 7, %s1520_s24  }
  0xec   : > { %s1521_s30 = sshll.u32 %s952_s28, 4 }
  0xed   : > { %s955_s9 = sadd.s32 %s1521_s30, %s953_s29 }
  0xee   : > { %s956_s13 = scalar_lea.vmem %s1980_s3, %s955_s9 }
  0xef   : > { %v972_v58 = vld [vmem:[%s956_s13] sm:$0x1]  ;;  %v974_v59 = vld [vmem:[%s956_s13 + $0x8] sm:$0x1] }
  0xf0   : > { %973 = vst [vmem:[#allocation3 + $0x6] sm:$0x1] %v972_v58 }
  0xf1   : > { %975 = vst [vmem:[#allocation3 + $0xe] sm:$0x1] %v974_v59 }
  0xf2   : > { %995 = vsyncadd [#allocation4 + $0x1], 32  ;;  %s1522_s15 = sld [smem:[#allocation6 + $0x7]] }
  0xf8   : > { %s997_s16 = sshrl.u32 %s1522_s15, 3  ;;  %s998_s11 = sand.u32 7, %s1522_s15  }
  0xf9   : > { %s1523_s17 = sshll.u32 %s997_s16, 4 }
  0xfa   : > { %s1000_s19 = sadd.s32 %s1523_s17, %s998_s11 }
  0xfb   : > { %s1001_s22 = scalar_lea.vmem %s1979_s2, %s1000_s19 }
  0xfc   : > { %v1017_v60 = vld [vmem:[%s1001_s22] sm:$0x1]  ;;  %v1019_v61 = vld [vmem:[%s1001_s22 + $0x8] sm:$0x1] }
  0xfd   : > { %1018 = vst [vmem:[#allocation2 + $0x7] sm:$0x1] %v1017_v60 }
  0xfe   : > { %1020 = vst [vmem:[#allocation2 + $0xf] sm:$0x1] %v1019_v61 }
  0xff   : > { %1040 = vsyncadd [#allocation4], 32  ;;  %s1524_s25 = sld [smem:[#allocation7 + $0x7]] }
 0x105   : > { %s1042_s26 = sshrl.u32 %s1524_s25, 3  ;;  %s1043_s24 = sand.u32 7, %s1524_s25  }
 0x106   : > { %s1525_s28 = sshll.u32 %s1042_s26, 4 }
 0x107   : > { %s1045_s29 = sadd.s32 %s1525_s28, %s1043_s24 }
 0x108   : > { %s1046_s23 = scalar_lea.vmem %s1980_s3, %s1045_s29 }
 0x109   : > { %v1062_v62 = vld [vmem:[%s1046_s23] sm:$0x1]  ;;  %v1064_v63 = vld [vmem:[%s1046_s23 + $0x8] sm:$0x1] }
 0x10a   : > { %1063 = vst [vmem:[#allocation3 + $0x7] sm:$0x1] %v1062_v62 }
 0x10b   : > { %1065 = vst [vmem:[#allocation3 + $0xf] sm:$0x1] %v1064_v63 }
 0x10c   : > { %1085 = vsyncadd [#allocation4 + $0x1], 32 }
 0x10d   : > { %1679 = dma.done.wait [#allocation4], 32 }
 0x10e   : > { %1680 = vsyncadd [#allocation4], 4294967264 }
 0x10f   : > { %1681 = dma.done.wait [#allocation4 + $0x1], 32 }
 0x110   : > { %1682 = vsyncadd [#allocation4 + $0x1], 4294967264 }
 0x111   : > { %1683 = dma.done.wait [#allocation4], 32 }
 0x112   : > { %1684 = vsyncadd [#allocation4], 4294967264 }
 0x113   : > { %1685 = dma.done.wait [#allocation4 + $0x1], 32 }
 0x114   : > { %1686 = vsyncadd [#allocation4 + $0x1], 4294967264 }
 0x115   : > { %1687 = dma.done.wait [#allocation4], 32 }
 0x116   : > { %1688 = vsyncadd [#allocation4], 4294967264 }
 0x117   : > { %1689 = dma.done.wait [#allocation4 + $0x1], 32 }
 0x118   : > { %1690 = vsyncadd [#allocation4 + $0x1], 4294967264 }
 0x119   : > { %1691 = dma.done.wait [#allocation4], 32 }
 0x11a   : > { %1692 = vsyncadd [#allocation4], 4294967264 }
 0x11b   : > { %1693 = dma.done.wait [#allocation4 + $0x1], 32 }
 0x11c   : > { %1694 = vsyncadd [#allocation4 + $0x1], 4294967264 }
 0x11d   : > { %1695 = dma.done.wait [#allocation4], 32 }
 0x11e   : > { %1696 = vsyncadd [#allocation4], 4294967264 }
 0x11f   : > { %1697 = dma.done.wait [#allocation4 + $0x1], 32 }
 0x120   : > { %1698 = vsyncadd [#allocation4 + $0x1], 4294967264 }
 0x121   : > { %1699 = dma.done.wait [#allocation4], 32 }
 0x122   : > { %1700 = vsyncadd [#allocation4], 4294967264 }
 0x123   : > { %1701 = dma.done.wait [#allocation4 + $0x1], 32 }
 0x124   : > { %1702 = vsyncadd [#allocation4 + $0x1], 4294967264 }
 0x125   : > { %1703 = dma.done.wait [#allocation4], 32 }
 0x126   : > { %1704 = vsyncadd [#allocation4], 4294967264 }
 0x127   : > { %1705 = dma.done.wait [#allocation4 + $0x1], 32 }
 0x128   : > { %1706 = vsyncadd [#allocation4 + $0x1], 4294967264 }
 0x129   : > { %1707 = dma.done.wait [#allocation4], 32 }
 0x12a   : > { %1708 = vsyncadd [#allocation4], 4294967264 }
 0x12b   : > { %1709 = dma.done.wait [#allocation4 + $0x1], 32 }
 0x12c   : > { %1710 = vsyncadd [#allocation4 + $0x1], 4294967264  ;;  %v1601_v0 = vld [vmem:[%s1896_s18 + $0x38] sm:$0xff]  ;;  %v1600_v2 = vld [vmem:[%s1896_s18 + $0x30] sm:$0xff]  ;;  %v1725_v4 = vmov 0  }
 0x12d   : > { %v1609_v1 = vld [vmem:[%s1896_s18 + $0x78] sm:$0xff]  ;;  %1259 = vmatpush.bf16.msra.mxu0 %v1601_v0  ;;  %v1608_v3 = vld [vmem:[%s1896_s18 + $0x70] sm:$0xff]  ;;  %1637 = vset.pattern.permute.xlu0 %v1725_v4  ;;  %v1599_v5 = vld [vmem:[%s1896_s18 + $0x28] sm:$0xff] }
 0x12e   : > { %1272 = vmatpush.bf16.msra.mxu1 %v1609_v1  ;;  %v1607_v6 = vld [vmem:[%s1896_s18 + $0x68] sm:$0xff]  ;;  %v1286_v7 = vld [vmem:[%s1983_s6] sm:$0xff]  ;;  %v1597_v10 = vld [vmem:[%s1896_s18 + $0x18] sm:$0xff] }
 0x12f   : > { %1289 = vperm.xlu0 %1637, %v1286_v7   ;;  %v1598_v8 = vld [vmem:[%s1896_s18 + $0x20] sm:$0xff]  ;;  %v1605_v11 = vld [vmem:[%s1896_s18 + $0x58] sm:$0xff]  ;;  %v1596_v12 = vld [vmem:[%s1896_s18 + $0x10] sm:$0xff] }
 0x130   : > { %v1606_v9 = vld [vmem:[%s1896_s18 + $0x60] sm:$0xff]  ;;  %v1604_v13 = vld [vmem:[%s1896_s18 + $0x50] sm:$0xff]  ;;  %v1595_v14 = vld [vmem:[%s1896_s18 + $0x8] sm:$0xff] }
 0x131   : > { %1260 = vmatpush.bf16.msra.mxu0 %v1600_v2  ;;  %v1603_v15 = vld [vmem:[%s1896_s18 + $0x48] sm:$0xff]  ;;  %v1119_v16 = vld [vmem:[#allocation2] sm:$0xff]  ;;  %v1121_v17 = vld [vmem:[#allocation3] sm:$0xff] }
 0x132   : > { %1273 = vmatpush.bf16.msra.mxu1 %v1608_v3  ;;  %v1120_v18 = vld [vmem:[#allocation2 + $0x8] sm:$0xff]  ;;  %v1122_v19 = vld [vmem:[#allocation3 + $0x8] sm:$0xff]  ;;  %v1123_v20 = vadd.f32 %v1121_v17, %v1119_v16  ;;  %v1594_v22 = vld [vmem:[%s1896_s18] sm:$0xff] }
 0x133   : > { %v1124_v21 = vadd.f32 %v1122_v19, %v1120_v18  ;;  %v1602_v23 = vld [vmem:[%s1896_s18 + $0x40] sm:$0xff] }
 0x134   : > { %v1125_v24 = vpack.c.bf16 %v1123_v20, %v1123_v20  ;;  %v1638_v26 = vld [vmem:[%s362_s27] ss:$0 sm:$0xff] }
 0x135   : > { %1261 = vmatpush.bf16.msra.mxu0 %v1599_v5  ;;  %v1126_v25 = vpack.c.bf16 %v1124_v21, %v1124_v21 }
 0x136   : > { %1274 = vmatpush.bf16.msra.mxu1 %v1607_v6 }
 0x139   : > { %1262 = vmatpush.bf16.msra.mxu0 %v1598_v8 }
 0x13a   : > { %1275 = vmatpush.bf16.msra.mxu1 %v1606_v9 }
 0x13d   : > { %1263 = vmatpush.bf16.msra.mxu0 %v1597_v10 }
 0x13e   : > { %1276 = vmatpush.bf16.msra.mxu1 %v1605_v11 }
 0x141   : > { %1264 = vmatpush.bf16.msra.mxu0 %v1596_v12 }
 0x142   : > { %1277 = vmatpush.bf16.msra.mxu1 %v1604_v13 }
 0x145   : > { %1265 = vmatpush.bf16.msra.mxu0 %v1595_v14 }
 0x146   : > { %1278 = vmatpush.bf16.msra.mxu1 %v1603_v15 }
 0x149   : > { %1266 = vmatpush.bf16.msra.mxu0 %v1594_v22 }
 0x14a   : > { %1279 = vmatpush.bf16.msra.mxu1 %v1602_v23 }
 0x14c   : > { %1267 = vmatmul.bf16.vlgmr.msra.gmra.mxu0 %v1125_v24 }
 0x14d   : > { %1280 = vmatmul.bf16.vlgmr.msra.gmra.mxu1 %v1126_v25 }
 0x1a1   : > { %v1290_v33 = vpop.permute.xlu0 %1289 }
 0x1c9   : > { %v1268_v27 = vpop.f32.mrf.mxu0 }
 0x1ca   : > { %v1281_v28 = vpop.f32.mrf.mxu1  ;;  %v1269_v29 = vadd.f32 %v1638_v26, %v1268_v27 }
 0x1cc   : > { %v1282_v30 = vadd.f32 %v1281_v28, %v1269_v29 }
 0x1ce   : > { %1639 = vtanh.f32 %v1282_v30 }
 0x1d1   : > { %v1270_v31 = vpop.f32.mrf.mxu0 }
 0x1d2   : > { %v1283_v32 = vpop.f32.mrf.mxu1 }
 0x1d4   : > { %v1640_v34 = vpop.eup %1639 }
 0x1d5   : > { %v1292_v35 = vmul.f32 %v1640_v34, %v1290_v33 }
 0x1d7   : > { %1293 = vst [vmem:[%s1891_s8] sm:$0xff] %v1292_v35 }
 0x1d8 PF: > { %p27_p9 = scmp.ge.s32.totalorder %s1789_s1, 4   ;;  %s1986_s9 = smov %s1717_s10 }
 0x1d9   : > { %s1987_s10 = smov %s1798_s14  ;;  %s1988_s11 = smov %s1789_s1 }
 0x1da   :  { %29 = sbr.rel (!%p27_p9) target bundleno = 9 (0x9), region = 687 }
 0x1df   :  { %1313 = vsyncmov [#allocation4] }
 0x1e2   :  { %s1314_s0 = vpop.sfrf %1313 }
 0x1e3   :  { %p1592_p10 = scmp.ne.s32.totalorder %s1314_s0, 0 }
 0x1e5   :  { %1318 = shalt.err (%p1592_p10)  }
 0x1e6   :  { %1320 = vsyncmov [#allocation4 + $0x1] }
 0x1e9   :  { %s1321_s27 = vpop.sfrf %1320 }
 0x1ea   :  { %p1593_p11 = scmp.ne.s32.totalorder %s1321_s27, 0 }
 0x1ec   :  { %1325 = shalt.err (%p1593_p11)  }

</bundles_post_ra>
